<compile_context>
chip_gen: v6e
topology: v6e:2x2x1
jax: 0.10.0
libtpu: 0.0.40
codegen_flags: <defaults>
</compile_context>

<pallas_src>
import functools

import jax
import jax.numpy as jnp
import numpy as np
from jax.experimental import pallas as pl
from jax.experimental.pallas import tpu as pltpu


def bilstm_kernel(x_ref, wih_ref, whh_ref, b_ref,
                  out_ref, hN_ref, cN_ref,
                  gx_ref):
    """Fused bidirectional LSTM over the whole (padded) sequence.

    x_ref   : (S*Bp, E)   embedded inputs, time-major, batch padded to Bp
    wih_ref : (E, 8H)     [W_ih_f^T | W_ih_r^T]   (gate order i,f,g,o per direction)
    whh_ref : (2H, 8H)    block-diagonal: [:H, :4H] = W_hh_f^T, [H:, 4H:] = W_hh_r^T
    b_ref   : (1, 8H)     [b_f | b_r]  (bias_ih + bias_hh per direction)
    out_ref : (S*Bp, 2H)  per-step hidden states; fwd in [:, :H], rev in [:, H:]
    hN_ref  : (2, Bp, H)  final hidden per direction
    cN_ref  : (2, Bp, H)  final cell per direction
    gx_ref  : (S*Bp, 8H)  VMEM scratch holding the hoisted input projection
    """
    SB, _ = x_ref.shape
    H = whh_ref.shape[0] // 2
    Bp = hN_ref.shape[1]
    S = SB // Bp

    # ---- Hoisted, time-parallel input projection: one big MXU matmul for both
    # directions and all timesteps. ----
    gx_ref[...] = (
        jnp.dot(x_ref[...], wih_ref[...], preferred_element_type=jnp.float32)
        + b_ref[...])

    whh = whh_ref[...]

    def gate_math(gates, c):
        # PyTorch gate order: i, f, g, o
        i_g = jax.nn.sigmoid(gates[:, 0 * H:1 * H])
        f_g = jax.nn.sigmoid(gates[:, 1 * H:2 * H])
        g_g = jnp.tanh(gates[:, 2 * H:3 * H])
        o_g = jax.nn.sigmoid(gates[:, 3 * H:4 * H])
        c_new = f_g * c + i_g * g_g
        h_new = o_g * jnp.tanh(c_new)
        return h_new, c_new

    def step(t, carry):
        h_cat, c_cat = carry                          # (Bp, 2H): [h_f | h_r]
        # One MXU push per step for BOTH directions (block-diagonal W_hh).
        gh = jnp.dot(h_cat, whh, preferred_element_type=jnp.float32)   # (Bp, 8H)

        off_f = pl.multiple_of(t * Bp, 8)             # fwd consumes/writes time t
        off_r = pl.multiple_of((S - 1 - t) * Bp, 8)   # rev consumes/writes time S-1-t

        gx_f = gx_ref[pl.ds(off_f, Bp), pl.ds(0, 4 * H)]       # (Bp, 4H)
        gx_r = gx_ref[pl.ds(off_r, Bp), pl.ds(4 * H, 4 * H)]   # (Bp, 4H)

        h_f, c_f = gate_math(gh[:, :4 * H] + gx_f, c_cat[:, :H])
        h_r, c_r = gate_math(gh[:, 4 * H:] + gx_r, c_cat[:, H:])

        out_ref[pl.ds(off_f, Bp), pl.ds(0, H)] = h_f.astype(out_ref.dtype)
        out_ref[pl.ds(off_r, Bp), pl.ds(H, H)] = h_r.astype(out_ref.dtype)

        return (jnp.concatenate([h_f, h_r], axis=1),
                jnp.concatenate([c_f, c_r], axis=1))

    h0 = jnp.zeros((Bp, 2 * H), jnp.float32)
    c0 = jnp.zeros((Bp, 2 * H), jnp.float32)
    h_cat, c_cat = jax.lax.fori_loop(0, S, step, (h0, c0), unroll=True)

    # Final states written unconditionally (no conditional-write hazard).
    hN_ref[0] = h_cat[:, :H]
    hN_ref[1] = h_cat[:, H:]
    cN_ref[0] = c_cat[:, :H]
    cN_ref[1] = c_cat[:, H:]


@jax.jit
def encoder_forward(src, params):
    # Embedding lookup (gather) — plain-JAX glue.
    # TODO(synk): could be fused into the kernel via scalar-prefetch row gather.
    emb = jnp.take(params["embedding"], src, axis=0)  # (S, B, E) f32

    S, B, E = emb.shape
    H = params["whh_f"].shape[0]
    Bp = ((B + 7) // 8) * 8                           # pad batch to sublane multiple

    emb_p = jnp.pad(emb, ((0, 0), (0, Bp - B), (0, 0)))
    x2d = emb_p.reshape(S * Bp, E)

    # Combined input-projection weights/bias: fwd gates in cols [:4H], rev in [4H:].
    wih_cat = jnp.concatenate([params["wih_f"], params["wih_r"]], axis=1)  # (E, 8H)
    b_cat = jnp.concatenate([params["b_f"], params["b_r"]], axis=1)        # (1, 8H)

    # Block-diagonal recurrent weights -> one fused MXU push per step.
    whh_blk = jnp.zeros((2 * H, 8 * H), jnp.float32)
    whh_blk = whh_blk.at[:H, :4 * H].set(params["whh_f"])
    whh_blk = whh_blk.at[H:, 4 * H:].set(params["whh_r"])

    vmem = pl.BlockSpec(memory_space=pltpu.MemorySpace.VMEM)
    out2d, hN, cN = pl.pallas_call(
        bilstm_kernel,
        out_shape=(
            jax.ShapeDtypeStruct((S * Bp, 2 * H), jnp.float32),
            jax.ShapeDtypeStruct((2, Bp, H), jnp.float32),
            jax.ShapeDtypeStruct((2, Bp, H), jnp.float32),
        ),
        in_specs=(vmem, vmem, vmem, vmem),
        out_specs=(vmem, vmem, vmem),
        scratch_shapes=(pltpu.VMEM((S * Bp, 8 * H), jnp.float32),),
    )(x2d, wih_cat, whh_blk, b_cat)

    outputs = out2d.reshape(S, Bp, 2 * H)[:, :B, :]   # (S, B, 2H)
    hidden = hN[:, :B, :]                             # (2, B, H)
    cell = cN[:, :B, :]                               # (2, B, H)
    return outputs, hidden, cell


def reference_forward(src, params):
    """Pure-JAX (lax.scan) reference matching torch.nn.LSTM semantics."""
    emb = jnp.take(params["embedding"], src, axis=0)
    H = params["whh_f"].shape[0]

    def run_dir(xs, wih_t, whh_t, b):
        def step(carry, x_t):
            h, c = carry
            gates = x_t @ wih_t + h @ whh_t + b
            i_g = jax.nn.sigmoid(gates[:, 0 * H:1 * H])
            f_g = jax.nn.sigmoid(gates[:, 1 * H:2 * H])
            g_g = jnp.tanh(gates[:, 2 * H:3 * H])
            o_g = jax.nn.sigmoid(gates[:, 3 * H:4 * H])
            c_new = f_g * c + i_g * g_g
            h_new = o_g * jnp.tanh(c_new)
            return (h_new, c_new), h_new

        B = xs.shape[1]
        h0 = jnp.zeros((B, H), jnp.float32)
        c0 = jnp.zeros((B, H), jnp.float32)
        (h_f, c_f), ys = jax.lax.scan(step, (h0, c0), xs)
        return ys, h_f, c_f

    out_f, h_f, c_f = run_dir(emb, params["wih_f"], params["whh_f"], params["b_f"])
    out_r, h_r, c_r = run_dir(emb[::-1], params["wih_r"], params["whh_r"], params["b_r"])
    out_r = out_r[::-1]
    outputs = jnp.concatenate([out_f, out_r], axis=-1)
    hidden = jnp.stack([h_f, h_r], axis=0)
    cell = jnp.stack([c_f, c_r], axis=0)
    return outputs, hidden, cell


def init_params(key, vocab_size, embedding_dim, hidden_dim):
    ks = jax.random.split(key, 11)
    k_inv = 1.0 / np.sqrt(hidden_dim)

    def uni(k, shape):
        return jax.random.uniform(k, shape, jnp.float32, -k_inv, k_inv)

    E, H = embedding_dim, hidden_dim
    params = {
        # nn.Embedding default init: N(0, 1)
        "embedding": jax.random.normal(ks[0], (vocab_size, E), jnp.float32),
        # forward direction (weights stored pre-transposed for x @ W^T layout)
        "wih_f": uni(ks[1], (E, 4 * H)),
        "whh_f": uni(ks[2], (H, 4 * H)),
        "b_f": (uni(ks[3], (1, 4 * H)) + uni(ks[4], (1, 4 * H))),
        # reverse direction
        "wih_r": uni(ks[5], (E, 4 * H)),
        "whh_r": uni(ks[6], (H, 4 * H)),
        "b_r": (uni(ks[7], (1, 4 * H)) + uni(ks[8], (1, 4 * H))),
    }
    return params


if __name__ == "__main__":
    VOCAB, EMB, HID = 50, 32, 32
    SEQ, BATCH = 8, 2

    key = jax.random.PRNGKey(0)
    k_param, k_src = jax.random.split(key)
    params = init_params(k_param, VOCAB, EMB, HID)
    src = jax.random.randint(k_src, (SEQ, BATCH), 0, VOCAB, dtype=jnp.int32)

    outputs, hidden, cell = encoder_forward(src, params)
    jax.block_until_ready((outputs, hidden, cell))

    assert outputs.shape == (SEQ, BATCH, 2 * HID)
    assert hidden.shape == (2, BATCH, HID)
    assert cell.shape == (2, BATCH, HID)

    # Numerical check against a pure-JAX lax.scan reference.
    ref_out, ref_h, ref_c = reference_forward(src, params)
    np.testing.assert_allclose(np.asarray(outputs), np.asarray(ref_out), rtol=1e-3, atol=1e-3)
    np.testing.assert_allclose(np.asarray(hidden), np.asarray(ref_h), rtol=1e-3, atol=1e-3)
    np.testing.assert_allclose(np.asarray(cell), np.asarray(ref_c), rtol=1e-3, atol=1e-3)

    print("KERNEL_OK")
</pallas_src>

<mosaic_0001>
module attributes {stable_mosaic.version = 11 : i64} {
  func.func @bilstm_kernel(%arg0: memref<64x32xf32, #tpu.memory_space<vmem>>, %arg1: memref<32x256xf32, #tpu.memory_space<vmem>>, %arg2: memref<64x256xf32, #tpu.memory_space<vmem>>, %arg3: memref<1x256xf32, #tpu.memory_space<vmem>>, %arg4: memref<64x64xf32, #tpu.memory_space<vmem>>, %arg5: memref<2x8x32xf32, #tpu.memory_space<vmem>>, %arg6: memref<2x8x32xf32, #tpu.memory_space<vmem>>, %arg7: memref<64x256xf32, #tpu.memory_space<vmem>>) attributes {dimension_semantics = [], scalar_prefetch = 0 : i64, scratch_operands = 1 : i64, tpu.core_type = #tpu.core_type<tc>} {
    %c0 = arith.constant 0 : index
    %c0_0 = arith.constant 0 : index
    %0 = vector.load %arg0[%c0, %c0_0] : memref<64x32xf32, #tpu.memory_space<vmem>>, vector<64x32xf32>
    %c0_1 = arith.constant 0 : index
    %c0_2 = arith.constant 0 : index
    %1 = vector.load %arg1[%c0_1, %c0_2] : memref<32x256xf32, #tpu.memory_space<vmem>>, vector<32x256xf32>
    %cst = arith.constant dense<0.000000e+00> : vector<64x256xf32>
    %2 = tpu.matmul %0, %1, %cst {dimension_numbers = #tpu.dot_dimension_numbers<[1], [0], [0], [1], [0, 0, 1, 1], [], []>} : vector<64x32xf32>, vector<32x256xf32>, vector<64x256xf32> -> vector<64x256xf32>
    %c0_3 = arith.constant 0 : index
    %c0_4 = arith.constant 0 : index
    %3 = vector.load %arg3[%c0_3, %c0_4] : memref<1x256xf32, #tpu.memory_space<vmem>>, vector<1x256xf32>
    %4 = vector.broadcast %3 : vector<1x256xf32> to vector<64x256xf32>
    %5 = arith.addf %2, %4 : vector<64x256xf32>
    %c0_5 = arith.constant 0 : index
    %c0_6 = arith.constant 0 : index
    %6 = vector.load %arg7[%c0_5, %c0_6] : memref<64x256xf32, #tpu.memory_space<vmem>>, vector<64x256xf32>
    tpu.vector_store %arg7[%c0_5, %c0_6], %5 {strides = array<i32>} : memref<64x256xf32, #tpu.memory_space<vmem>>, vector<64x256xf32>,
    %c0_7 = arith.constant 0 : index
    %c0_8 = arith.constant 0 : index
    %7 = vector.load %arg2[%c0_7, %c0_8] : memref<64x256xf32, #tpu.memory_space<vmem>>, vector<64x256xf32>
    %cst_9 = arith.constant 0.000000e+00 : f32
    %8 = vector.broadcast %cst_9 : f32 to vector<8x64xf32>
    %cst_10 = arith.constant 0.000000e+00 : f32
    %9 = vector.broadcast %cst_10 : f32 to vector<8x64xf32>
    %c0_i32 = arith.constant 0 : i32
    %cst_11 = arith.constant dense<0.000000e+00> : vector<8x256xf32>
    %10 = tpu.matmul %8, %7, %cst_11 {dimension_numbers = #tpu.dot_dimension_numbers<[1], [0], [0], [1], [0, 0, 1, 1], [], []>} : vector<8x64xf32>, vector<64x256xf32>, vector<8x256xf32> -> vector<8x256xf32>
    %c8_i32 = arith.constant 8 : i32
    %11 = arith.muli %c0_i32, %c8_i32 : i32
    %12 = tpu.assume_multiple %11, 8 : i32
    %c7_i32 = arith.constant 7 : i32
    %13 = arith.subi %c7_i32, %c0_i32 : i32
    %c8_i32_12 = arith.constant 8 : i32
    %14 = arith.muli %13, %c8_i32_12 : i32
    %15 = tpu.assume_multiple %14, 8 : i32
    %16 = arith.index_cast %12 : i32 to index
    %c0_13 = arith.constant 0 : index
    %17 = vector.load %arg7[%16, %c0_13] : memref<64x256xf32, #tpu.memory_space<vmem>>, vector<8x128xf32>
    %18 = arith.index_cast %15 : i32 to index
    %c128 = arith.constant 128 : index
    %19 = vector.load %arg7[%18, %c128] : memref<64x256xf32, #tpu.memory_space<vmem>>, vector<8x128xf32>
    %20 = vector.extract_strided_slice %10 {offsets = [0, 0], sizes = [8, 128], strides = [1, 1]} : vector<8x256xf32> to vector<8x128xf32>
    %21 = arith.addf %20, %17 : vector<8x128xf32>
    %22 = vector.extract_strided_slice %9 {offsets = [0, 0], sizes = [8, 32], strides = [1, 1]} : vector<8x64xf32> to vector<8x32xf32>
    %23 = vector.extract_strided_slice %21 {offsets = [0, 0], sizes = [8, 32], strides = [1, 1]} : vector<8x128xf32> to vector<8x32xf32>
    %24 = arith.negf %23 : vector<8x32xf32>
    %25 = math.exp %24 : vector<8x32xf32>
    %cst_14 = arith.constant 1.000000e+00 : f32
    %26 = vector.broadcast %cst_14 : f32 to vector<8x32xf32>
    %27 = arith.addf %26, %25 : vector<8x32xf32>
    %28 = arith.divf %26, %27 : vector<8x32xf32>
    %29 = vector.extract_strided_slice %21 {offsets = [0, 32], sizes = [8, 32], strides = [1, 1]} : vector<8x128xf32> to vector<8x32xf32>
    %30 = arith.negf %29 : vector<8x32xf32>
    %31 = math.exp %30 : vector<8x32xf32>
    %cst_15 = arith.constant 1.000000e+00 : f32
    %32 = vector.broadcast %cst_15 : f32 to vector<8x32xf32>
    %33 = arith.addf %32, %31 : vector<8x32xf32>
    %34 = arith.divf %32, %33 : vector<8x32xf32>
    %35 = vector.extract_strided_slice %21 {offsets = [0, 64], sizes = [8, 32], strides = [1, 1]} : vector<8x128xf32> to vector<8x32xf32>
    %36 = math.tanh %35 : vector<8x32xf32>
    %37 = vector.extract_strided_slice %21 {offsets = [0, 96], sizes = [8, 32], strides = [1, 1]} : vector<8x128xf32> to vector<8x32xf32>
    %38 = arith.negf %37 : vector<8x32xf32>
    %39 = math.exp %38 : vector<8x32xf32>
    %cst_16 = arith.constant 1.000000e+00 : f32
    %40 = vector.broadcast %cst_16 : f32 to vector<8x32xf32>
    %41 = arith.addf %40, %39 : vector<8x32xf32>
    %42 = arith.divf %40, %41 : vector<8x32xf32>
    %43 = arith.mulf %34, %22 : vector<8x32xf32>
    %44 = arith.mulf %28, %36 : vector<8x32xf32>
    %45 = arith.addf %43, %44 : vector<8x32xf32>
    %46 = math.tanh %45 : vector<8x32xf32>
    %47 = arith.mulf %42, %46 : vector<8x32xf32>
    %48 = vector.extract_strided_slice %10 {offsets = [0, 128], sizes = [8, 128], strides = [1, 1]} : vector<8x256xf32> to vector<8x128xf32>
    %49 = arith.addf %48, %19 : vector<8x128xf32>
    %50 = vector.extract_strided_slice %9 {offsets = [0, 32], sizes = [8, 32], strides = [1, 1]} : vector<8x64xf32> to vector<8x32xf32>
    %51 = vector.extract_strided_slice %49 {offsets = [0, 0], sizes = [8, 32], strides = [1, 1]} : vector<8x128xf32> to vector<8x32xf32>
    %52 = arith.negf %51 : vector<8x32xf32>
    %53 = math.exp %52 : vector<8x32xf32>
    %cst_17 = arith.constant 1.000000e+00 : f32
    %54 = vector.broadcast %cst_17 : f32 to vector<8x32xf32>
    %55 = arith.addf %54, %53 : vector<8x32xf32>
    %56 = arith.divf %54, %55 : vector<8x32xf32>
    %57 = vector.extract_strided_slice %49 {offsets = [0, 32], sizes = [8, 32], strides = [1, 1]} : vector<8x128xf32> to vector<8x32xf32>
    %58 = arith.negf %57 : vector<8x32xf32>
    %59 = math.exp %58 : vector<8x32xf32>
    %cst_18 = arith.constant 1.000000e+00 : f32
    %60 = vector.broadcast %cst_18 : f32 to vector<8x32xf32>
    %61 = arith.addf %60, %59 : vector<8x32xf32>
    %62 = arith.divf %60, %61 : vector<8x32xf32>
    %63 = vector.extract_strided_slice %49 {offsets = [0, 64], sizes = [8, 32], strides = [1, 1]} : vector<8x128xf32> to vector<8x32xf32>
    %64 = math.tanh %63 : vector<8x32xf32>
    %65 = vector.extract_strided_slice %49 {offsets = [0, 96], sizes = [8, 32], strides = [1, 1]} : vector<8x128xf32> to vector<8x32xf32>
    %66 = arith.negf %65 : vector<8x32xf32>
    %67 = math.exp %66 : vector<8x32xf32>
    %cst_19 = arith.constant 1.000000e+00 : f32
    %68 = vector.broadcast %cst_19 : f32 to vector<8x32xf32>
    %69 = arith.addf %68, %67 : vector<8x32xf32>
    %70 = arith.divf %68, %69 : vector<8x32xf32>
    %71 = arith.mulf %62, %50 : vector<8x32xf32>
    %72 = arith.mulf %56, %64 : vector<8x32xf32>
    %73 = arith.addf %71, %72 : vector<8x32xf32>
    %74 = math.tanh %73 : vector<8x32xf32>
    %75 = arith.mulf %70, %74 : vector<8x32xf32>
    %76 = arith.index_cast %12 : i32 to index
    %c0_20 = arith.constant 0 : index
    %77 = vector.load %arg4[%76, %c0_20] : memref<64x64xf32, #tpu.memory_space<vmem>>, vector<8x32xf32>
    tpu.vector_store %arg4[%76, %c0_20], %47 {strides = array<i32>} : memref<64x64xf32, #tpu.memory_space<vmem>>, vector<8x32xf32>,
    %78 = arith.index_cast %15 : i32 to index
    %c32 = arith.constant 32 : index
    %79 = vector.load %arg4[%78, %c32] : memref<64x64xf32, #tpu.memory_space<vmem>>, vector<8x32xf32>
    tpu.vector_store %arg4[%78, %c32], %75 {strides = array<i32>} : memref<64x64xf32, #tpu.memory_space<vmem>>, vector<8x32xf32>,
    %80 = tpu.concatenate %47, %75 in 1 : vector<8x32xf32>, vector<8x32xf32> -> vector<8x64xf32>
    %81 = tpu.concatenate %45, %73 in 1 : vector<8x32xf32>, vector<8x32xf32> -> vector<8x64xf32>
    %c1_i32 = arith.constant 1 : i32
    %cst_21 = arith.constant dense<0.000000e+00> : vector<8x256xf32>
    %82 = tpu.matmul %80, %7, %cst_21 {dimension_numbers = #tpu.dot_dimension_numbers<[1], [0], [0], [1], [0, 0, 1, 1], [], []>} : vector<8x64xf32>, vector<64x256xf32>, vector<8x256xf32> -> vector<8x256xf32>
    %c8_i32_22 = arith.constant 8 : i32
    %83 = arith.muli %c1_i32, %c8_i32_22 : i32
    %84 = tpu.assume_multiple %83, 8 : i32
    %c7_i32_23 = arith.constant 7 : i32
    %85 = arith.subi %c7_i32_23, %c1_i32 : i32
    %c8_i32_24 = arith.constant 8 : i32
    %86 = arith.muli %85, %c8_i32_24 : i32
    %87 = tpu.assume_multiple %86, 8 : i32
    %88 = arith.index_cast %84 : i32 to index
    %c0_25 = arith.constant 0 : index
    %89 = vector.load %arg7[%88, %c0_25] : memref<64x256xf32, #tpu.memory_space<vmem>>, vector<8x128xf32>
    %90 = arith.index_cast %87 : i32 to index
    %c128_26 = arith.constant 128 : index
    %91 = vector.load %arg7[%90, %c128_26] : memref<64x256xf32, #tpu.memory_space<vmem>>, vector<8x128xf32>
    %92 = vector.extract_strided_slice %82 {offsets = [0, 0], sizes = [8, 128], strides = [1, 1]} : vector<8x256xf32> to vector<8x128xf32>
    %93 = arith.addf %92, %89 : vector<8x128xf32>
    %94 = vector.extract_strided_slice %81 {offsets = [0, 0], sizes = [8, 32], strides = [1, 1]} : vector<8x64xf32> to vector<8x32xf32>
    %95 = vector.extract_strided_slice %93 {offsets = [0, 0], sizes = [8, 32], strides = [1, 1]} : vector<8x128xf32> to vector<8x32xf32>
    %96 = arith.negf %95 : vector<8x32xf32>
    %97 = math.exp %96 : vector<8x32xf32>
    %cst_27 = arith.constant 1.000000e+00 : f32
    %98 = vector.broadcast %cst_27 : f32 to vector<8x32xf32>
    %99 = arith.addf %98, %97 : vector<8x32xf32>
    %100 = arith.divf %98, %99 : vector<8x32xf32>
    %101 = vector.extract_strided_slice %93 {offsets = [0, 32], sizes = [8, 32], strides = [1, 1]} : vector<8x128xf32> to vector<8x32xf32>
    %102 = arith.negf %101 : vector<8x32xf32>
    %103 = math.exp %102 : vector<8x32xf32>
    %cst_28 = arith.constant 1.000000e+00 : f32
    %104 = vector.broadcast %cst_28 : f32 to vector<8x32xf32>
    %105 = arith.addf %104, %103 : vector<8x32xf32>
    %106 = arith.divf %104, %105 : vector<8x32xf32>
    %107 = vector.extract_strided_slice %93 {offsets = [0, 64], sizes = [8, 32], strides = [1, 1]} : vector<8x128xf32> to vector<8x32xf32>
    %108 = math.tanh %107 : vector<8x32xf32>
    %109 = vector.extract_strided_slice %93 {offsets = [0, 96], sizes = [8, 32], strides = [1, 1]} : vector<8x128xf32> to vector<8x32xf32>
    %110 = arith.negf %109 : vector<8x32xf32>
    %111 = math.exp %110 : vector<8x32xf32>
    %cst_29 = arith.constant 1.000000e+00 : f32
    %112 = vector.broadcast %cst_29 : f32 to vector<8x32xf32>
    %113 = arith.addf %112, %111 : vector<8x32xf32>
    %114 = arith.divf %112, %113 : vector<8x32xf32>
    %115 = arith.mulf %106, %94 : vector<8x32xf32>
    %116 = arith.mulf %100, %108 : vector<8x32xf32>
    %117 = arith.addf %115, %116 : vector<8x32xf32>
    %118 = math.tanh %117 : vector<8x32xf32>
    %119 = arith.mulf %114, %118 : vector<8x32xf32>
    %120 = vector.extract_strided_slice %82 {offsets = [0, 128], sizes = [8, 128], strides = [1, 1]} : vector<8x256xf32> to vector<8x128xf32>
    %121 = arith.addf %120, %91 : vector<8x128xf32>
    %122 = vector.extract_strided_slice %81 {offsets = [0, 32], sizes = [8, 32], strides = [1, 1]} : vector<8x64xf32> to vector<8x32xf32>
    %123 = vector.extract_strided_slice %121 {offsets = [0, 0], sizes = [8, 32], strides = [1, 1]} : vector<8x128xf32> to vector<8x32xf32>
    %124 = arith.negf %123 : vector<8x32xf32>
    %125 = math.exp %124 : vector<8x32xf32>
    %cst_30 = arith.constant 1.000000e+00 : f32
    %126 = vector.broadcast %cst_30 : f32 to vector<8x32xf32>
    %127 = arith.addf %126, %125 : vector<8x32xf32>
    %128 = arith.divf %126, %127 : vector<8x32xf32>
    %129 = vector.extract_strided_slice %121 {offsets = [0, 32], sizes = [8, 32], strides = [1, 1]} : vector<8x128xf32> to vector<8x32xf32>
    %130 = arith.negf %129 : vector<8x32xf32>
    %131 = math.exp %130 : vector<8x32xf32>
    %cst_31 = arith.constant 1.000000e+00 : f32
    %132 = vector.broadcast %cst_31 : f32 to vector<8x32xf32>
    %133 = arith.addf %132, %131 : vector<8x32xf32>
    %134 = arith.divf %132, %133 : vector<8x32xf32>
    %135 = vector.extract_strided_slice %121 {offsets = [0, 64], sizes = [8, 32], strides = [1, 1]} : vector<8x128xf32> to vector<8x32xf32>
    %136 = math.tanh %135 : vector<8x32xf32>
    %137 = vector.extract_strided_slice %121 {offsets = [0, 96], sizes = [8, 32], strides = [1, 1]} : vector<8x128xf32> to vector<8x32xf32>
    %138 = arith.negf %137 : vector<8x32xf32>
    %139 = math.exp %138 : vector<8x32xf32>
    %cst_32 = arith.constant 1.000000e+00 : f32
    %140 = vector.broadcast %cst_32 : f32 to vector<8x32xf32>
    %141 = arith.addf %140, %139 : vector<8x32xf32>
    %142 = arith.divf %140, %141 : vector<8x32xf32>
    %143 = arith.mulf %134, %122 : vector<8x32xf32>
    %144 = arith.mulf %128, %136 : vector<8x32xf32>
    %145 = arith.addf %143, %144 : vector<8x32xf32>
    %146 = math.tanh %145 : vector<8x32xf32>
    %147 = arith.mulf %142, %146 : vector<8x32xf32>
    %148 = arith.index_cast %84 : i32 to index
    %c0_33 = arith.constant 0 : index
    %149 = vector.load %arg4[%148, %c0_33] : memref<64x64xf32, #tpu.memory_space<vmem>>, vector<8x32xf32>
    tpu.vector_store %arg4[%148, %c0_33], %119 {strides = array<i32>} : memref<64x64xf32, #tpu.memory_space<vmem>>, vector<8x32xf32>,
    %150 = arith.index_cast %87 : i32 to index
    %c32_34 = arith.constant 32 : index
    %151 = vector.load %arg4[%150, %c32_34] : memref<64x64xf32, #tpu.memory_space<vmem>>, vector<8x32xf32>
    tpu.vector_store %arg4[%150, %c32_34], %147 {strides = array<i32>} : memref<64x64xf32, #tpu.memory_space<vmem>>, vector<8x32xf32>,
    %152 = tpu.concatenate %119, %147 in 1 : vector<8x32xf32>, vector<8x32xf32> -> vector<8x64xf32>
    %153 = tpu.concatenate %117, %145 in 1 : vector<8x32xf32>, vector<8x32xf32> -> vector<8x64xf32>
    %c2_i32 = arith.constant 2 : i32
    %cst_35 = arith.constant dense<0.000000e+00> : vector<8x256xf32>
    %154 = tpu.matmul %152, %7, %cst_35 {dimension_numbers = #tpu.dot_dimension_numbers<[1], [0], [0], [1], [0, 0, 1, 1], [], []>} : vector<8x64xf32>, vector<64x256xf32>, vector<8x256xf32> -> vector<8x256xf32>
    %c8_i32_36 = arith.constant 8 : i32
    %155 = arith.muli %c2_i32, %c8_i32_36 : i32
    %156 = tpu.assume_multiple %155, 8 : i32
    %c7_i32_37 = arith.constant 7 : i32
    %157 = arith.subi %c7_i32_37, %c2_i32 : i32
    %c8_i32_38 = arith.constant 8 : i32
    %158 = arith.muli %157, %c8_i32_38 : i32
    %159 = tpu.assume_multiple %158, 8 : i32
    %160 = arith.index_cast %156 : i32 to index
    %c0_39 = arith.constant 0 : index
    %161 = vector.load %arg7[%160, %c0_39] : memref<64x256xf32, #tpu.memory_space<vmem>>, vector<8x128xf32>
    %162 = arith.index_cast %159 : i32 to index
    %c128_40 = arith.constant 128 : index
    %163 = vector.load %arg7[%162, %c128_40] : memref<64x256xf32, #tpu.memory_space<vmem>>, vector<8x128xf32>
    %164 = vector.extract_strided_slice %154 {offsets = [0, 0], sizes = [8, 128], strides = [1, 1]} : vector<8x256xf32> to vector<8x128xf32>
    %165 = arith.addf %164, %161 : vector<8x128xf32>
    %166 = vector.extract_strided_slice %153 {offsets = [0, 0], sizes = [8, 32], strides = [1, 1]} : vector<8x64xf32> to vector<8x32xf32>
    %167 = vector.extract_strided_slice %165 {offsets = [0, 0], sizes = [8, 32], strides = [1, 1]} : vector<8x128xf32> to vector<8x32xf32>
    %168 = arith.negf %167 : vector<8x32xf32>
    %169 = math.exp %168 : vector<8x32xf32>
    %cst_41 = arith.constant 1.000000e+00 : f32
    %170 = vector.broadcast %cst_41 : f32 to vector<8x32xf32>
    %171 = arith.addf %170, %169 : vector<8x32xf32>
    %172 = arith.divf %170, %171 : vector<8x32xf32>
    %173 = vector.extract_strided_slice %165 {offsets = [0, 32], sizes = [8, 32], strides = [1, 1]} : vector<8x128xf32> to vector<8x32xf32>
    %174 = arith.negf %173 : vector<8x32xf32>
    %175 = math.exp %174 : vector<8x32xf32>
    %cst_42 = arith.constant 1.000000e+00 : f32
    %176 = vector.broadcast %cst_42 : f32 to vector<8x32xf32>
    %177 = arith.addf %176, %175 : vector<8x32xf32>
    %178 = arith.divf %176, %177 : vector<8x32xf32>
    %179 = vector.extract_strided_slice %165 {offsets = [0, 64], sizes = [8, 32], strides = [1, 1]} : vector<8x128xf32> to vector<8x32xf32>
    %180 = math.tanh %179 : vector<8x32xf32>
    %181 = vector.extract_strided_slice %165 {offsets = [0, 96], sizes = [8, 32], strides = [1, 1]} : vector<8x128xf32> to vector<8x32xf32>
    %182 = arith.negf %181 : vector<8x32xf32>
    %183 = math.exp %182 : vector<8x32xf32>
    %cst_43 = arith.constant 1.000000e+00 : f32
    %184 = vector.broadcast %cst_43 : f32 to vector<8x32xf32>
    %185 = arith.addf %184, %183 : vector<8x32xf32>
    %186 = arith.divf %184, %185 : vector<8x32xf32>
    %187 = arith.mulf %178, %166 : vector<8x32xf32>
    %188 = arith.mulf %172, %180 : vector<8x32xf32>
    %189 = arith.addf %187, %188 : vector<8x32xf32>
    %190 = math.tanh %189 : vector<8x32xf32>
    %191 = arith.mulf %186, %190 : vector<8x32xf32>
    %192 = vector.extract_strided_slice %154 {offsets = [0, 128], sizes = [8, 128], strides = [1, 1]} : vector<8x256xf32> to vector<8x128xf32>
    %193 = arith.addf %192, %163 : vector<8x128xf32>
    %194 = vector.extract_strided_slice %153 {offsets = [0, 32], sizes = [8, 32], strides = [1, 1]} : vector<8x64xf32> to vector<8x32xf32>
    %195 = vector.extract_strided_slice %193 {offsets = [0, 0], sizes = [8, 32], strides = [1, 1]} : vector<8x128xf32> to vector<8x32xf32>
    %196 = arith.negf %195 : vector<8x32xf32>
    %197 = math.exp %196 : vector<8x32xf32>
    %cst_44 = arith.constant 1.000000e+00 : f32
    %198 = vector.broadcast %cst_44 : f32 to vector<8x32xf32>
    %199 = arith.addf %198, %197 : vector<8x32xf32>
    %200 = arith.divf %198, %199 : vector<8x32xf32>
    %201 = vector.extract_strided_slice %193 {offsets = [0, 32], sizes = [8, 32], strides = [1, 1]} : vector<8x128xf32> to vector<8x32xf32>
    %202 = arith.negf %201 : vector<8x32xf32>
    %203 = math.exp %202 : vector<8x32xf32>
    %cst_45 = arith.constant 1.000000e+00 : f32
    %204 = vector.broadcast %cst_45 : f32 to vector<8x32xf32>
    %205 = arith.addf %204, %203 : vector<8x32xf32>
    %206 = arith.divf %204, %205 : vector<8x32xf32>
    %207 = vector.extract_strided_slice %193 {offsets = [0, 64], sizes = [8, 32], strides = [1, 1]} : vector<8x128xf32> to vector<8x32xf32>
    %208 = math.tanh %207 : vector<8x32xf32>
    %209 = vector.extract_strided_slice %193 {offsets = [0, 96], sizes = [8, 32], strides = [1, 1]} : vector<8x128xf32> to vector<8x32xf32>
    %210 = arith.negf %209 : vector<8x32xf32>
    %211 = math.exp %210 : vector<8x32xf32>
    %cst_46 = arith.constant 1.000000e+00 : f32
    %212 = vector.broadcast %cst_46 : f32 to vector<8x32xf32>
    %213 = arith.addf %212, %211 : vector<8x32xf32>
    %214 = arith.divf %212, %213 : vector<8x32xf32>
    %215 = arith.mulf %206, %194 : vector<8x32xf32>
    %216 = arith.mulf %200, %208 : vector<8x32xf32>
    %217 = arith.addf %215, %216 : vector<8x32xf32>
    %218 = math.tanh %217 : vector<8x32xf32>
    %219 = arith.mulf %214, %218 : vector<8x32xf32>
    %220 = arith.index_cast %156 : i32 to index
    %c0_47 = arith.constant 0 : index
    %221 = vector.load %arg4[%220, %c0_47] : memref<64x64xf32, #tpu.memory_space<vmem>>, vector<8x32xf32>
    tpu.vector_store %arg4[%220, %c0_47], %191 {strides = array<i32>} : memref<64x64xf32, #tpu.memory_space<vmem>>, vector<8x32xf32>,
    %222 = arith.index_cast %159 : i32 to index
    %c32_48 = arith.constant 32 : index
    %223 = vector.load %arg4[%222, %c32_48] : memref<64x64xf32, #tpu.memory_space<vmem>>, vector<8x32xf32>
    tpu.vector_store %arg4[%222, %c32_48], %219 {strides = array<i32>} : memref<64x64xf32, #tpu.memory_space<vmem>>, vector<8x32xf32>,
    %224 = tpu.concatenate %191, %219 in 1 : vector<8x32xf32>, vector<8x32xf32> -> vector<8x64xf32>
    %225 = tpu.concatenate %189, %217 in 1 : vector<8x32xf32>, vector<8x32xf32> -> vector<8x64xf32>
    %c3_i32 = arith.constant 3 : i32
    %cst_49 = arith.constant dense<0.000000e+00> : vector<8x256xf32>
    %226 = tpu.matmul %224, %7, %cst_49 {dimension_numbers = #tpu.dot_dimension_numbers<[1], [0], [0], [1], [0, 0, 1, 1], [], []>} : vector<8x64xf32>, vector<64x256xf32>, vector<8x256xf32> -> vector<8x256xf32>
    %c8_i32_50 = arith.constant 8 : i32
    %227 = arith.muli %c3_i32, %c8_i32_50 : i32
    %228 = tpu.assume_multiple %227, 8 : i32
    %c7_i32_51 = arith.constant 7 : i32
    %229 = arith.subi %c7_i32_51, %c3_i32 : i32
    %c8_i32_52 = arith.constant 8 : i32
    %230 = arith.muli %229, %c8_i32_52 : i32
    %231 = tpu.assume_multiple %230, 8 : i32
    %232 = arith.index_cast %228 : i32 to index
    %c0_53 = arith.constant 0 : index
    %233 = vector.load %arg7[%232, %c0_53] : memref<64x256xf32, #tpu.memory_space<vmem>>, vector<8x128xf32>
    %234 = arith.index_cast %231 : i32 to index
    %c128_54 = arith.constant 128 : index
    %235 = vector.load %arg7[%234, %c128_54] : memref<64x256xf32, #tpu.memory_space<vmem>>, vector<8x128xf32>
    %236 = vector.extract_strided_slice %226 {offsets = [0, 0], sizes = [8, 128], strides = [1, 1]} : vector<8x256xf32> to vector<8x128xf32>
    %237 = arith.addf %236, %233 : vector<8x128xf32>
    %238 = vector.extract_strided_slice %225 {offsets = [0, 0], sizes = [8, 32], strides = [1, 1]} : vector<8x64xf32> to vector<8x32xf32>
    %239 = vector.extract_strided_slice %237 {offsets = [0, 0], sizes = [8, 32], strides = [1, 1]} : vector<8x128xf32> to vector<8x32xf32>
    %240 = arith.negf %239 : vector<8x32xf32>
    %241 = math.exp %240 : vector<8x32xf32>
    %cst_55 = arith.constant 1.000000e+00 : f32
    %242 = vector.broadcast %cst_55 : f32 to vector<8x32xf32>
    %243 = arith.addf %242, %241 : vector<8x32xf32>
    %244 = arith.divf %242, %243 : vector<8x32xf32>
    %245 = vector.extract_strided_slice %237 {offsets = [0, 32], sizes = [8, 32], strides = [1, 1]} : vector<8x128xf32> to vector<8x32xf32>
    %246 = arith.negf %245 : vector<8x32xf32>
    %247 = math.exp %246 : vector<8x32xf32>
    %cst_56 = arith.constant 1.000000e+00 : f32
    %248 = vector.broadcast %cst_56 : f32 to vector<8x32xf32>
    %249 = arith.addf %248, %247 : vector<8x32xf32>
    %250 = arith.divf %248, %249 : vector<8x32xf32>
    %251 = vector.extract_strided_slice %237 {offsets = [0, 64], sizes = [8, 32], strides = [1, 1]} : vector<8x128xf32> to vector<8x32xf32>
    %252 = math.tanh %251 : vector<8x32xf32>
    %253 = vector.extract_strided_slice %237 {offsets = [0, 96], sizes = [8, 32], strides = [1, 1]} : vector<8x128xf32> to vector<8x32xf32>
    %254 = arith.negf %253 : vector<8x32xf32>
    %255 = math.exp %254 : vector<8x32xf32>
    %cst_57 = arith.constant 1.000000e+00 : f32
    %256 = vector.broadcast %cst_57 : f32 to vector<8x32xf32>
    %257 = arith.addf %256, %255 : vector<8x32xf32>
    %258 = arith.divf %256, %257 : vector<8x32xf32>
    %259 = arith.mulf %250, %238 : vector<8x32xf32>
    %260 = arith.mulf %244, %252 : vector<8x32xf32>
    %261 = arith.addf %259, %260 : vector<8x32xf32>
    %262 = math.tanh %261 : vector<8x32xf32>
    %263 = arith.mulf %258, %262 : vector<8x32xf32>
    %264 = vector.extract_strided_slice %226 {offsets = [0, 128], sizes = [8, 128], strides = [1, 1]} : vector<8x256xf32> to vector<8x128xf32>
    %265 = arith.addf %264, %235 : vector<8x128xf32>
    %266 = vector.extract_strided_slice %225 {offsets = [0, 32], sizes = [8, 32], strides = [1, 1]} : vector<8x64xf32> to vector<8x32xf32>
    %267 = vector.extract_strided_slice %265 {offsets = [0, 0], sizes = [8, 32], strides = [1, 1]} : vector<8x128xf32> to vector<8x32xf32>
    %268 = arith.negf %267 : vector<8x32xf32>
    %269 = math.exp %268 : vector<8x32xf32>
    %cst_58 = arith.constant 1.000000e+00 : f32
    %270 = vector.broadcast %cst_58 : f32 to vector<8x32xf32>
    %271 = arith.addf %270, %269 : vector<8x32xf32>
    %272 = arith.divf %270, %271 : vector<8x32xf32>
    %273 = vector.extract_strided_slice %265 {offsets = [0, 32], sizes = [8, 32], strides = [1, 1]} : vector<8x128xf32> to vector<8x32xf32>
    %274 = arith.negf %273 : vector<8x32xf32>
    %275 = math.exp %274 : vector<8x32xf32>
    %cst_59 = arith.constant 1.000000e+00 : f32
    %276 = vector.broadcast %cst_59 : f32 to vector<8x32xf32>
    %277 = arith.addf %276, %275 : vector<8x32xf32>
    %278 = arith.divf %276, %277 : vector<8x32xf32>
    %279 = vector.extract_strided_slice %265 {offsets = [0, 64], sizes = [8, 32], strides = [1, 1]} : vector<8x128xf32> to vector<8x32xf32>
    %280 = math.tanh %279 : vector<8x32xf32>
    %281 = vector.extract_strided_slice %265 {offsets = [0, 96], sizes = [8, 32], strides = [1, 1]} : vector<8x128xf32> to vector<8x32xf32>
    %282 = arith.negf %281 : vector<8x32xf32>
    %283 = math.exp %282 : vector<8x32xf32>
    %cst_60 = arith.constant 1.000000e+00 : f32
    %284 = vector.broadcast %cst_60 : f32 to vector<8x32xf32>
    %285 = arith.addf %284, %283 : vector<8x32xf32>
    %286 = arith.divf %284, %285 : vector<8x32xf32>
    %287 = arith.mulf %278, %266 : vector<8x32xf32>
    %288 = arith.mulf %272, %280 : vector<8x32xf32>
    %289 = arith.addf %287, %288 : vector<8x32xf32>
    %290 = math.tanh %289 : vector<8x32xf32>
    %291 = arith.mulf %286, %290 : vector<8x32xf32>
    %292 = arith.index_cast %228 : i32 to index
    %c0_61 = arith.constant 0 : index
    %293 = vector.load %arg4[%292, %c0_61] : memref<64x64xf32, #tpu.memory_space<vmem>>, vector<8x32xf32>
    tpu.vector_store %arg4[%292, %c0_61], %263 {strides = array<i32>} : memref<64x64xf32, #tpu.memory_space<vmem>>, vector<8x32xf32>,
    %294 = arith.index_cast %231 : i32 to index
    %c32_62 = arith.constant 32 : index
    %295 = vector.load %arg4[%294, %c32_62] : memref<64x64xf32, #tpu.memory_space<vmem>>, vector<8x32xf32>
    tpu.vector_store %arg4[%294, %c32_62], %291 {strides = array<i32>} : memref<64x64xf32, #tpu.memory_space<vmem>>, vector<8x32xf32>,
    %296 = tpu.concatenate %263, %291 in 1 : vector<8x32xf32>, vector<8x32xf32> -> vector<8x64xf32>
    %297 = tpu.concatenate %261, %289 in 1 : vector<8x32xf32>, vector<8x32xf32> -> vector<8x64xf32>
    %c4_i32 = arith.constant 4 : i32
    %cst_63 = arith.constant dense<0.000000e+00> : vector<8x256xf32>
    %298 = tpu.matmul %296, %7, %cst_63 {dimension_numbers = #tpu.dot_dimension_numbers<[1], [0], [0], [1], [0, 0, 1, 1], [], []>} : vector<8x64xf32>, vector<64x256xf32>, vector<8x256xf32> -> vector<8x256xf32>
    %c8_i32_64 = arith.constant 8 : i32
    %299 = arith.muli %c4_i32, %c8_i32_64 : i32
    %300 = tpu.assume_multiple %299, 8 : i32
    %c7_i32_65 = arith.constant 7 : i32
    %301 = arith.subi %c7_i32_65, %c4_i32 : i32
    %c8_i32_66 = arith.constant 8 : i32
    %302 = arith.muli %301, %c8_i32_66 : i32
    %303 = tpu.assume_multiple %302, 8 : i32
    %304 = arith.index_cast %300 : i32 to index
    %c0_67 = arith.constant 0 : index
    %305 = vector.load %arg7[%304, %c0_67] : memref<64x256xf32, #tpu.memory_space<vmem>>, vector<8x128xf32>
    %306 = arith.index_cast %303 : i32 to index
    %c128_68 = arith.constant 128 : index
    %307 = vector.load %arg7[%306, %c128_68] : memref<64x256xf32, #tpu.memory_space<vmem>>, vector<8x128xf32>
    %308 = vector.extract_strided_slice %298 {offsets = [0, 0], sizes = [8, 128], strides = [1, 1]} : vector<8x256xf32> to vector<8x128xf32>
    %309 = arith.addf %308, %305 : vector<8x128xf32>
    %310 = vector.extract_strided_slice %297 {offsets = [0, 0], sizes = [8, 32], strides = [1, 1]} : vector<8x64xf32> to vector<8x32xf32>
    %311 = vector.extract_strided_slice %309 {offsets = [0, 0], sizes = [8, 32], strides = [1, 1]} : vector<8x128xf32> to vector<8x32xf32>
    %312 = arith.negf %311 : vector<8x32xf32>
    %313 = math.exp %312 : vector<8x32xf32>
    %cst_69 = arith.constant 1.000000e+00 : f32
    %314 = vector.broadcast %cst_69 : f32 to vector<8x32xf32>
    %315 = arith.addf %314, %313 : vector<8x32xf32>
    %316 = arith.divf %314, %315 : vector<8x32xf32>
    %317 = vector.extract_strided_slice %309 {offsets = [0, 32], sizes = [8, 32], strides = [1, 1]} : vector<8x128xf32> to vector<8x32xf32>
    %318 = arith.negf %317 : vector<8x32xf32>
    %319 = math.exp %318 : vector<8x32xf32>
    %cst_70 = arith.constant 1.000000e+00 : f32
    %320 = vector.broadcast %cst_70 : f32 to vector<8x32xf32>
    %321 = arith.addf %320, %319 : vector<8x32xf32>
    %322 = arith.divf %320, %321 : vector<8x32xf32>
    %323 = vector.extract_strided_slice %309 {offsets = [0, 64], sizes = [8, 32], strides = [1, 1]} : vector<8x128xf32> to vector<8x32xf32>
    %324 = math.tanh %323 : vector<8x32xf32>
    %325 = vector.extract_strided_slice %309 {offsets = [0, 96], sizes = [8, 32], strides = [1, 1]} : vector<8x128xf32> to vector<8x32xf32>
    %326 = arith.negf %325 : vector<8x32xf32>
    %327 = math.exp %326 : vector<8x32xf32>
    %cst_71 = arith.constant 1.000000e+00 : f32
    %328 = vector.broadcast %cst_71 : f32 to vector<8x32xf32>
    %329 = arith.addf %328, %327 : vector<8x32xf32>
    %330 = arith.divf %328, %329 : vector<8x32xf32>
    %331 = arith.mulf %322, %310 : vector<8x32xf32>
    %332 = arith.mulf %316, %324 : vector<8x32xf32>
    %333 = arith.addf %331, %332 : vector<8x32xf32>
    %334 = math.tanh %333 : vector<8x32xf32>
    %335 = arith.mulf %330, %334 : vector<8x32xf32>
    %336 = vector.extract_strided_slice %298 {offsets = [0, 128], sizes = [8, 128], strides = [1, 1]} : vector<8x256xf32> to vector<8x128xf32>
    %337 = arith.addf %336, %307 : vector<8x128xf32>
    %338 = vector.extract_strided_slice %297 {offsets = [0, 32], sizes = [8, 32], strides = [1, 1]} : vector<8x64xf32> to vector<8x32xf32>
    %339 = vector.extract_strided_slice %337 {offsets = [0, 0], sizes = [8, 32], strides = [1, 1]} : vector<8x128xf32> to vector<8x32xf32>
    %340 = arith.negf %339 : vector<8x32xf32>
    %341 = math.exp %340 : vector<8x32xf32>
    %cst_72 = arith.constant 1.000000e+00 : f32
    %342 = vector.broadcast %cst_72 : f32 to vector<8x32xf32>
    %343 = arith.addf %342, %341 : vector<8x32xf32>
    %344 = arith.divf %342, %343 : vector<8x32xf32>
    %345 = vector.extract_strided_slice %337 {offsets = [0, 32], sizes = [8, 32], strides = [1, 1]} : vector<8x128xf32> to vector<8x32xf32>
    %346 = arith.negf %345 : vector<8x32xf32>
    %347 = math.exp %346 : vector<8x32xf32>
    %cst_73 = arith.constant 1.000000e+00 : f32
    %348 = vector.broadcast %cst_73 : f32 to vector<8x32xf32>
    %349 = arith.addf %348, %347 : vector<8x32xf32>
    %350 = arith.divf %348, %349 : vector<8x32xf32>
    %351 = vector.extract_strided_slice %337 {offsets = [0, 64], sizes = [8, 32], strides = [1, 1]} : vector<8x128xf32> to vector<8x32xf32>
    %352 = math.tanh %351 : vector<8x32xf32>
    %353 = vector.extract_strided_slice %337 {offsets = [0, 96], sizes = [8, 32], strides = [1, 1]} : vector<8x128xf32> to vector<8x32xf32>
    %354 = arith.negf %353 : vector<8x32xf32>
    %355 = math.exp %354 : vector<8x32xf32>
    %cst_74 = arith.constant 1.000000e+00 : f32
    %356 = vector.broadcast %cst_74 : f32 to vector<8x32xf32>
    %357 = arith.addf %356, %355 : vector<8x32xf32>
    %358 = arith.divf %356, %357 : vector<8x32xf32>
    %359 = arith.mulf %350, %338 : vector<8x32xf32>
    %360 = arith.mulf %344, %352 : vector<8x32xf32>
    %361 = arith.addf %359, %360 : vector<8x32xf32>
    %362 = math.tanh %361 : vector<8x32xf32>
    %363 = arith.mulf %358, %362 : vector<8x32xf32>
    %364 = arith.index_cast %300 : i32 to index
    %c0_75 = arith.constant 0 : index
    %365 = vector.load %arg4[%364, %c0_75] : memref<64x64xf32, #tpu.memory_space<vmem>>, vector<8x32xf32>
    tpu.vector_store %arg4[%364, %c0_75], %335 {strides = array<i32>} : memref<64x64xf32, #tpu.memory_space<vmem>>, vector<8x32xf32>,
    %366 = arith.index_cast %303 : i32 to index
    %c32_76 = arith.constant 32 : index
    %367 = vector.load %arg4[%366, %c32_76] : memref<64x64xf32, #tpu.memory_space<vmem>>, vector<8x32xf32>
    tpu.vector_store %arg4[%366, %c32_76], %363 {strides = array<i32>} : memref<64x64xf32, #tpu.memory_space<vmem>>, vector<8x32xf32>,
    %368 = tpu.concatenate %335, %363 in 1 : vector<8x32xf32>, vector<8x32xf32> -> vector<8x64xf32>
    %369 = tpu.concatenate %333, %361 in 1 : vector<8x32xf32>, vector<8x32xf32> -> vector<8x64xf32>
    %c5_i32 = arith.constant 5 : i32
    %cst_77 = arith.constant dense<0.000000e+00> : vector<8x256xf32>
    %370 = tpu.matmul %368, %7, %cst_77 {dimension_numbers = #tpu.dot_dimension_numbers<[1], [0], [0], [1], [0, 0, 1, 1], [], []>} : vector<8x64xf32>, vector<64x256xf32>, vector<8x256xf32> -> vector<8x256xf32>
    %c8_i32_78 = arith.constant 8 : i32
    %371 = arith.muli %c5_i32, %c8_i32_78 : i32
    %372 = tpu.assume_multiple %371, 8 : i32
    %c7_i32_79 = arith.constant 7 : i32
    %373 = arith.subi %c7_i32_79, %c5_i32 : i32
    %c8_i32_80 = arith.constant 8 : i32
    %374 = arith.muli %373, %c8_i32_80 : i32
    %375 = tpu.assume_multiple %374, 8 : i32
    %376 = arith.index_cast %372 : i32 to index
    %c0_81 = arith.constant 0 : index
    %377 = vector.load %arg7[%376, %c0_81] : memref<64x256xf32, #tpu.memory_space<vmem>>, vector<8x128xf32>
    %378 = arith.index_cast %375 : i32 to index
    %c128_82 = arith.constant 128 : index
    %379 = vector.load %arg7[%378, %c128_82] : memref<64x256xf32, #tpu.memory_space<vmem>>, vector<8x128xf32>
    %380 = vector.extract_strided_slice %370 {offsets = [0, 0], sizes = [8, 128], strides = [1, 1]} : vector<8x256xf32> to vector<8x128xf32>
    %381 = arith.addf %380, %377 : vector<8x128xf32>
    %382 = vector.extract_strided_slice %369 {offsets = [0, 0], sizes = [8, 32], strides = [1, 1]} : vector<8x64xf32> to vector<8x32xf32>
    %383 = vector.extract_strided_slice %381 {offsets = [0, 0], sizes = [8, 32], strides = [1, 1]} : vector<8x128xf32> to vector<8x32xf32>
    %384 = arith.negf %383 : vector<8x32xf32>
    %385 = math.exp %384 : vector<8x32xf32>
    %cst_83 = arith.constant 1.000000e+00 : f32
    %386 = vector.broadcast %cst_83 : f32 to vector<8x32xf32>
    %387 = arith.addf %386, %385 : vector<8x32xf32>
    %388 = arith.divf %386, %387 : vector<8x32xf32>
    %389 = vector.extract_strided_slice %381 {offsets = [0, 32], sizes = [8, 32], strides = [1, 1]} : vector<8x128xf32> to vector<8x32xf32>
    %390 = arith.negf %389 : vector<8x32xf32>
    %391 = math.exp %390 : vector<8x32xf32>
    %cst_84 = arith.constant 1.000000e+00 : f32
    %392 = vector.broadcast %cst_84 : f32 to vector<8x32xf32>
    %393 = arith.addf %392, %391 : vector<8x32xf32>
    %394 = arith.divf %392, %393 : vector<8x32xf32>
    %395 = vector.extract_strided_slice %381 {offsets = [0, 64], sizes = [8, 32], strides = [1, 1]} : vector<8x128xf32> to vector<8x32xf32>
    %396 = math.tanh %395 : vector<8x32xf32>
    %397 = vector.extract_strided_slice %381 {offsets = [0, 96], sizes = [8, 32], strides = [1, 1]} : vector<8x128xf32> to vector<8x32xf32>
    %398 = arith.negf %397 : vector<8x32xf32>
    %399 = math.exp %398 : vector<8x32xf32>
    %cst_85 = arith.constant 1.000000e+00 : f32
    %400 = vector.broadcast %cst_85 : f32 to vector<8x32xf32>
    %401 = arith.addf %400, %399 : vector<8x32xf32>
    %402 = arith.divf %400, %401 : vector<8x32xf32>
    %403 = arith.mulf %394, %382 : vector<8x32xf32>
    %404 = arith.mulf %388, %396 : vector<8x32xf32>
    %405 = arith.addf %403, %404 : vector<8x32xf32>
    %406 = math.tanh %405 : vector<8x32xf32>
    %407 = arith.mulf %402, %406 : vector<8x32xf32>
    %408 = vector.extract_strided_slice %370 {offsets = [0, 128], sizes = [8, 128], strides = [1, 1]} : vector<8x256xf32> to vector<8x128xf32>
    %409 = arith.addf %408, %379 : vector<8x128xf32>
    %410 = vector.extract_strided_slice %369 {offsets = [0, 32], sizes = [8, 32], strides = [1, 1]} : vector<8x64xf32> to vector<8x32xf32>
    %411 = vector.extract_strided_slice %409 {offsets = [0, 0], sizes = [8, 32], strides = [1, 1]} : vector<8x128xf32> to vector<8x32xf32>
    %412 = arith.negf %411 : vector<8x32xf32>
    %413 = math.exp %412 : vector<8x32xf32>
    %cst_86 = arith.constant 1.000000e+00 : f32
    %414 = vector.broadcast %cst_86 : f32 to vector<8x32xf32>
    %415 = arith.addf %414, %413 : vector<8x32xf32>
    %416 = arith.divf %414, %415 : vector<8x32xf32>
    %417 = vector.extract_strided_slice %409 {offsets = [0, 32], sizes = [8, 32], strides = [1, 1]} : vector<8x128xf32> to vector<8x32xf32>
    %418 = arith.negf %417 : vector<8x32xf32>
    %419 = math.exp %418 : vector<8x32xf32>
    %cst_87 = arith.constant 1.000000e+00 : f32
    %420 = vector.broadcast %cst_87 : f32 to vector<8x32xf32>
    %421 = arith.addf %420, %419 : vector<8x32xf32>
    %422 = arith.divf %420, %421 : vector<8x32xf32>
    %423 = vector.extract_strided_slice %409 {offsets = [0, 64], sizes = [8, 32], strides = [1, 1]} : vector<8x128xf32> to vector<8x32xf32>
    %424 = math.tanh %423 : vector<8x32xf32>
    %425 = vector.extract_strided_slice %409 {offsets = [0, 96], sizes = [8, 32], strides = [1, 1]} : vector<8x128xf32> to vector<8x32xf32>
    %426 = arith.negf %425 : vector<8x32xf32>
    %427 = math.exp %426 : vector<8x32xf32>
    %cst_88 = arith.constant 1.000000e+00 : f32
    %428 = vector.broadcast %cst_88 : f32 to vector<8x32xf32>
    %429 = arith.addf %428, %427 : vector<8x32xf32>
    %430 = arith.divf %428, %429 : vector<8x32xf32>
    %431 = arith.mulf %422, %410 : vector<8x32xf32>
    %432 = arith.mulf %416, %424 : vector<8x32xf32>
    %433 = arith.addf %431, %432 : vector<8x32xf32>
    %434 = math.tanh %433 : vector<8x32xf32>
    %435 = arith.mulf %430, %434 : vector<8x32xf32>
    %436 = arith.index_cast %372 : i32 to index
    %c0_89 = arith.constant 0 : index
    %437 = vector.load %arg4[%436, %c0_89] : memref<64x64xf32, #tpu.memory_space<vmem>>, vector<8x32xf32>
    tpu.vector_store %arg4[%436, %c0_89], %407 {strides = array<i32>} : memref<64x64xf32, #tpu.memory_space<vmem>>, vector<8x32xf32>,
    %438 = arith.index_cast %375 : i32 to index
    %c32_90 = arith.constant 32 : index
    %439 = vector.load %arg4[%438, %c32_90] : memref<64x64xf32, #tpu.memory_space<vmem>>, vector<8x32xf32>
    tpu.vector_store %arg4[%438, %c32_90], %435 {strides = array<i32>} : memref<64x64xf32, #tpu.memory_space<vmem>>, vector<8x32xf32>,
    %440 = tpu.concatenate %407, %435 in 1 : vector<8x32xf32>, vector<8x32xf32> -> vector<8x64xf32>
    %441 = tpu.concatenate %405, %433 in 1 : vector<8x32xf32>, vector<8x32xf32> -> vector<8x64xf32>
    %c6_i32 = arith.constant 6 : i32
    %cst_91 = arith.constant dense<0.000000e+00> : vector<8x256xf32>
    %442 = tpu.matmul %440, %7, %cst_91 {dimension_numbers = #tpu.dot_dimension_numbers<[1], [0], [0], [1], [0, 0, 1, 1], [], []>} : vector<8x64xf32>, vector<64x256xf32>, vector<8x256xf32> -> vector<8x256xf32>
    %c8_i32_92 = arith.constant 8 : i32
    %443 = arith.muli %c6_i32, %c8_i32_92 : i32
    %444 = tpu.assume_multiple %443, 8 : i32
    %c7_i32_93 = arith.constant 7 : i32
    %445 = arith.subi %c7_i32_93, %c6_i32 : i32
    %c8_i32_94 = arith.constant 8 : i32
    %446 = arith.muli %445, %c8_i32_94 : i32
    %447 = tpu.assume_multiple %446, 8 : i32
    %448 = arith.index_cast %444 : i32 to index
    %c0_95 = arith.constant 0 : index
    %449 = vector.load %arg7[%448, %c0_95] : memref<64x256xf32, #tpu.memory_space<vmem>>, vector<8x128xf32>
    %450 = arith.index_cast %447 : i32 to index
    %c128_96 = arith.constant 128 : index
    %451 = vector.load %arg7[%450, %c128_96] : memref<64x256xf32, #tpu.memory_space<vmem>>, vector<8x128xf32>
    %452 = vector.extract_strided_slice %442 {offsets = [0, 0], sizes = [8, 128], strides = [1, 1]} : vector<8x256xf32> to vector<8x128xf32>
    %453 = arith.addf %452, %449 : vector<8x128xf32>
    %454 = vector.extract_strided_slice %441 {offsets = [0, 0], sizes = [8, 32], strides = [1, 1]} : vector<8x64xf32> to vector<8x32xf32>
    %455 = vector.extract_strided_slice %453 {offsets = [0, 0], sizes = [8, 32], strides = [1, 1]} : vector<8x128xf32> to vector<8x32xf32>
    %456 = arith.negf %455 : vector<8x32xf32>
    %457 = math.exp %456 : vector<8x32xf32>
    %cst_97 = arith.constant 1.000000e+00 : f32
    %458 = vector.broadcast %cst_97 : f32 to vector<8x32xf32>
    %459 = arith.addf %458, %457 : vector<8x32xf32>
    %460 = arith.divf %458, %459 : vector<8x32xf32>
    %461 = vector.extract_strided_slice %453 {offsets = [0, 32], sizes = [8, 32], strides = [1, 1]} : vector<8x128xf32> to vector<8x32xf32>
    %462 = arith.negf %461 : vector<8x32xf32>
    %463 = math.exp %462 : vector<8x32xf32>
    %cst_98 = arith.constant 1.000000e+00 : f32
    %464 = vector.broadcast %cst_98 : f32 to vector<8x32xf32>
    %465 = arith.addf %464, %463 : vector<8x32xf32>
    %466 = arith.divf %464, %465 : vector<8x32xf32>
    %467 = vector.extract_strided_slice %453 {offsets = [0, 64], sizes = [8, 32], strides = [1, 1]} : vector<8x128xf32> to vector<8x32xf32>
    %468 = math.tanh %467 : vector<8x32xf32>
    %469 = vector.extract_strided_slice %453 {offsets = [0, 96], sizes = [8, 32], strides = [1, 1]} : vector<8x128xf32> to vector<8x32xf32>
    %470 = arith.negf %469 : vector<8x32xf32>
    %471 = math.exp %470 : vector<8x32xf32>
    %cst_99 = arith.constant 1.000000e+00 : f32
    %472 = vector.broadcast %cst_99 : f32 to vector<8x32xf32>
    %473 = arith.addf %472, %471 : vector<8x32xf32>
    %474 = arith.divf %472, %473 : vector<8x32xf32>
    %475 = arith.mulf %466, %454 : vector<8x32xf32>
    %476 = arith.mulf %460, %468 : vector<8x32xf32>
    %477 = arith.addf %475, %476 : vector<8x32xf32>
    %478 = math.tanh %477 : vector<8x32xf32>
    %479 = arith.mulf %474, %478 : vector<8x32xf32>
    %480 = vector.extract_strided_slice %442 {offsets = [0, 128], sizes = [8, 128], strides = [1, 1]} : vector<8x256xf32> to vector<8x128xf32>
    %481 = arith.addf %480, %451 : vector<8x128xf32>
    %482 = vector.extract_strided_slice %441 {offsets = [0, 32], sizes = [8, 32], strides = [1, 1]} : vector<8x64xf32> to vector<8x32xf32>
    %483 = vector.extract_strided_slice %481 {offsets = [0, 0], sizes = [8, 32], strides = [1, 1]} : vector<8x128xf32> to vector<8x32xf32>
    %484 = arith.negf %483 : vector<8x32xf32>
    %485 = math.exp %484 : vector<8x32xf32>
    %cst_100 = arith.constant 1.000000e+00 : f32
    %486 = vector.broadcast %cst_100 : f32 to vector<8x32xf32>
    %487 = arith.addf %486, %485 : vector<8x32xf32>
    %488 = arith.divf %486, %487 : vector<8x32xf32>
    %489 = vector.extract_strided_slice %481 {offsets = [0, 32], sizes = [8, 32], strides = [1, 1]} : vector<8x128xf32> to vector<8x32xf32>
    %490 = arith.negf %489 : vector<8x32xf32>
    %491 = math.exp %490 : vector<8x32xf32>
    %cst_101 = arith.constant 1.000000e+00 : f32
    %492 = vector.broadcast %cst_101 : f32 to vector<8x32xf32>
    %493 = arith.addf %492, %491 : vector<8x32xf32>
    %494 = arith.divf %492, %493 : vector<8x32xf32>
    %495 = vector.extract_strided_slice %481 {offsets = [0, 64], sizes = [8, 32], strides = [1, 1]} : vector<8x128xf32> to vector<8x32xf32>
    %496 = math.tanh %495 : vector<8x32xf32>
    %497 = vector.extract_strided_slice %481 {offsets = [0, 96], sizes = [8, 32], strides = [1, 1]} : vector<8x128xf32> to vector<8x32xf32>
    %498 = arith.negf %497 : vector<8x32xf32>
    %499 = math.exp %498 : vector<8x32xf32>
    %cst_102 = arith.constant 1.000000e+00 : f32
    %500 = vector.broadcast %cst_102 : f32 to vector<8x32xf32>
    %501 = arith.addf %500, %499 : vector<8x32xf32>
    %502 = arith.divf %500, %501 : vector<8x32xf32>
    %503 = arith.mulf %494, %482 : vector<8x32xf32>
    %504 = arith.mulf %488, %496 : vector<8x32xf32>
    %505 = arith.addf %503, %504 : vector<8x32xf32>
    %506 = math.tanh %505 : vector<8x32xf32>
    %507 = arith.mulf %502, %506 : vector<8x32xf32>
    %508 = arith.index_cast %444 : i32 to index
    %c0_103 = arith.constant 0 : index
    %509 = vector.load %arg4[%508, %c0_103] : memref<64x64xf32, #tpu.memory_space<vmem>>, vector<8x32xf32>
    tpu.vector_store %arg4[%508, %c0_103], %479 {strides = array<i32>} : memref<64x64xf32, #tpu.memory_space<vmem>>, vector<8x32xf32>,
    %510 = arith.index_cast %447 : i32 to index
    %c32_104 = arith.constant 32 : index
    %511 = vector.load %arg4[%510, %c32_104] : memref<64x64xf32, #tpu.memory_space<vmem>>, vector<8x32xf32>
    tpu.vector_store %arg4[%510, %c32_104], %507 {strides = array<i32>} : memref<64x64xf32, #tpu.memory_space<vmem>>, vector<8x32xf32>,
    %512 = tpu.concatenate %479, %507 in 1 : vector<8x32xf32>, vector<8x32xf32> -> vector<8x64xf32>
    %513 = tpu.concatenate %477, %505 in 1 : vector<8x32xf32>, vector<8x32xf32> -> vector<8x64xf32>
    %c7_i32_105 = arith.constant 7 : i32
    %cst_106 = arith.constant dense<0.000000e+00> : vector<8x256xf32>
    %514 = tpu.matmul %512, %7, %cst_106 {dimension_numbers = #tpu.dot_dimension_numbers<[1], [0], [0], [1], [0, 0, 1, 1], [], []>} : vector<8x64xf32>, vector<64x256xf32>, vector<8x256xf32> -> vector<8x256xf32>
    %c8_i32_107 = arith.constant 8 : i32
    %515 = arith.muli %c7_i32_105, %c8_i32_107 : i32
    %516 = tpu.assume_multiple %515, 8 : i32
    %c7_i32_108 = arith.constant 7 : i32
    %517 = arith.subi %c7_i32_108, %c7_i32_105 : i32
    %c8_i32_109 = arith.constant 8 : i32
    %518 = arith.muli %517, %c8_i32_109 : i32
    %519 = tpu.assume_multiple %518, 8 : i32
    %520 = arith.index_cast %516 : i32 to index
    %c0_110 = arith.constant 0 : index
    %521 = vector.load %arg7[%520, %c0_110] : memref<64x256xf32, #tpu.memory_space<vmem>>, vector<8x128xf32>
    %522 = arith.index_cast %519 : i32 to index
    %c128_111 = arith.constant 128 : index
    %523 = vector.load %arg7[%522, %c128_111] : memref<64x256xf32, #tpu.memory_space<vmem>>, vector<8x128xf32>
    %524 = vector.extract_strided_slice %514 {offsets = [0, 0], sizes = [8, 128], strides = [1, 1]} : vector<8x256xf32> to vector<8x128xf32>
    %525 = arith.addf %524, %521 : vector<8x128xf32>
    %526 = vector.extract_strided_slice %513 {offsets = [0, 0], sizes = [8, 32], strides = [1, 1]} : vector<8x64xf32> to vector<8x32xf32>
    %527 = vector.extract_strided_slice %525 {offsets = [0, 0], sizes = [8, 32], strides = [1, 1]} : vector<8x128xf32> to vector<8x32xf32>
    %528 = arith.negf %527 : vector<8x32xf32>
    %529 = math.exp %528 : vector<8x32xf32>
    %cst_112 = arith.constant 1.000000e+00 : f32
    %530 = vector.broadcast %cst_112 : f32 to vector<8x32xf32>
    %531 = arith.addf %530, %529 : vector<8x32xf32>
    %532 = arith.divf %530, %531 : vector<8x32xf32>
    %533 = vector.extract_strided_slice %525 {offsets = [0, 32], sizes = [8, 32], strides = [1, 1]} : vector<8x128xf32> to vector<8x32xf32>
    %534 = arith.negf %533 : vector<8x32xf32>
    %535 = math.exp %534 : vector<8x32xf32>
    %cst_113 = arith.constant 1.000000e+00 : f32
    %536 = vector.broadcast %cst_113 : f32 to vector<8x32xf32>
    %537 = arith.addf %536, %535 : vector<8x32xf32>
    %538 = arith.divf %536, %537 : vector<8x32xf32>
    %539 = vector.extract_strided_slice %525 {offsets = [0, 64], sizes = [8, 32], strides = [1, 1]} : vector<8x128xf32> to vector<8x32xf32>
    %540 = math.tanh %539 : vector<8x32xf32>
    %541 = vector.extract_strided_slice %525 {offsets = [0, 96], sizes = [8, 32], strides = [1, 1]} : vector<8x128xf32> to vector<8x32xf32>
    %542 = arith.negf %541 : vector<8x32xf32>
    %543 = math.exp %542 : vector<8x32xf32>
    %cst_114 = arith.constant 1.000000e+00 : f32
    %544 = vector.broadcast %cst_114 : f32 to vector<8x32xf32>
    %545 = arith.addf %544, %543 : vector<8x32xf32>
    %546 = arith.divf %544, %545 : vector<8x32xf32>
    %547 = arith.mulf %538, %526 : vector<8x32xf32>
    %548 = arith.mulf %532, %540 : vector<8x32xf32>
    %549 = arith.addf %547, %548 : vector<8x32xf32>
    %550 = math.tanh %549 : vector<8x32xf32>
    %551 = arith.mulf %546, %550 : vector<8x32xf32>
    %552 = vector.extract_strided_slice %514 {offsets = [0, 128], sizes = [8, 128], strides = [1, 1]} : vector<8x256xf32> to vector<8x128xf32>
    %553 = arith.addf %552, %523 : vector<8x128xf32>
    %554 = vector.extract_strided_slice %513 {offsets = [0, 32], sizes = [8, 32], strides = [1, 1]} : vector<8x64xf32> to vector<8x32xf32>
    %555 = vector.extract_strided_slice %553 {offsets = [0, 0], sizes = [8, 32], strides = [1, 1]} : vector<8x128xf32> to vector<8x32xf32>
    %556 = arith.negf %555 : vector<8x32xf32>
    %557 = math.exp %556 : vector<8x32xf32>
    %cst_115 = arith.constant 1.000000e+00 : f32
    %558 = vector.broadcast %cst_115 : f32 to vector<8x32xf32>
    %559 = arith.addf %558, %557 : vector<8x32xf32>
    %560 = arith.divf %558, %559 : vector<8x32xf32>
    %561 = vector.extract_strided_slice %553 {offsets = [0, 32], sizes = [8, 32], strides = [1, 1]} : vector<8x128xf32> to vector<8x32xf32>
    %562 = arith.negf %561 : vector<8x32xf32>
    %563 = math.exp %562 : vector<8x32xf32>
    %cst_116 = arith.constant 1.000000e+00 : f32
    %564 = vector.broadcast %cst_116 : f32 to vector<8x32xf32>
    %565 = arith.addf %564, %563 : vector<8x32xf32>
    %566 = arith.divf %564, %565 : vector<8x32xf32>
    %567 = vector.extract_strided_slice %553 {offsets = [0, 64], sizes = [8, 32], strides = [1, 1]} : vector<8x128xf32> to vector<8x32xf32>
    %568 = math.tanh %567 : vector<8x32xf32>
    %569 = vector.extract_strided_slice %553 {offsets = [0, 96], sizes = [8, 32], strides = [1, 1]} : vector<8x128xf32> to vector<8x32xf32>
    %570 = arith.negf %569 : vector<8x32xf32>
    %571 = math.exp %570 : vector<8x32xf32>
    %cst_117 = arith.constant 1.000000e+00 : f32
    %572 = vector.broadcast %cst_117 : f32 to vector<8x32xf32>
    %573 = arith.addf %572, %571 : vector<8x32xf32>
    %574 = arith.divf %572, %573 : vector<8x32xf32>
    %575 = arith.mulf %566, %554 : vector<8x32xf32>
    %576 = arith.mulf %560, %568 : vector<8x32xf32>
    %577 = arith.addf %575, %576 : vector<8x32xf32>
    %578 = math.tanh %577 : vector<8x32xf32>
    %579 = arith.mulf %574, %578 : vector<8x32xf32>
    %580 = arith.index_cast %516 : i32 to index
    %c0_118 = arith.constant 0 : index
    %581 = vector.load %arg4[%580, %c0_118] : memref<64x64xf32, #tpu.memory_space<vmem>>, vector<8x32xf32>
    tpu.vector_store %arg4[%580, %c0_118], %551 {strides = array<i32>} : memref<64x64xf32, #tpu.memory_space<vmem>>, vector<8x32xf32>,
    %582 = arith.index_cast %519 : i32 to index
    %c32_119 = arith.constant 32 : index
    %583 = vector.load %arg4[%582, %c32_119] : memref<64x64xf32, #tpu.memory_space<vmem>>, vector<8x32xf32>
    tpu.vector_store %arg4[%582, %c32_119], %579 {strides = array<i32>} : memref<64x64xf32, #tpu.memory_space<vmem>>, vector<8x32xf32>,
    %584 = tpu.concatenate %551, %579 in 1 : vector<8x32xf32>, vector<8x32xf32> -> vector<8x64xf32>
    %585 = tpu.concatenate %549, %577 in 1 : vector<8x32xf32>, vector<8x32xf32> -> vector<8x64xf32>
    %c8_i32_120 = arith.constant 8 : i32
    %586 = vector.extract_strided_slice %584 {offsets = [0, 0], sizes = [8, 32], strides = [1, 1]} : vector<8x64xf32> to vector<8x32xf32>
    %c0_121 = arith.constant 0 : index
    %c0_122 = arith.constant 0 : index
    %c0_123 = arith.constant 0 : index
    %587 = vector.load %arg5[%c0_121, %c0_122, %c0_123] : memref<2x8x32xf32, #tpu.memory_space<vmem>>, vector<1x8x32xf32>
    %588 = vector.shape_cast %587 : vector<1x8x32xf32> to vector<8x32xf32>
    %589 = vector.shape_cast %586 : vector<8x32xf32> to vector<1x8x32xf32>
    tpu.vector_store %arg5[%c0_121, %c0_122, %c0_123], %589 {strides = array<i32>} : memref<2x8x32xf32, #tpu.memory_space<vmem>>, vector<1x8x32xf32>,
    %590 = vector.extract_strided_slice %584 {offsets = [0, 32], sizes = [8, 32], strides = [1, 1]} : vector<8x64xf32> to vector<8x32xf32>
    %c1 = arith.constant 1 : index
    %c0_124 = arith.constant 0 : index
    %c0_125 = arith.constant 0 : index
    %591 = vector.load %arg5[%c1, %c0_124, %c0_125] : memref<2x8x32xf32, #tpu.memory_space<vmem>>, vector<1x8x32xf32>
    %592 = vector.shape_cast %591 : vector<1x8x32xf32> to vector<8x32xf32>
    %593 = vector.shape_cast %590 : vector<8x32xf32> to vector<1x8x32xf32>
    tpu.vector_store %arg5[%c1, %c0_124, %c0_125], %593 {strides = array<i32>} : memref<2x8x32xf32, #tpu.memory_space<vmem>>, vector<1x8x32xf32>,
    %594 = vector.extract_strided_slice %585 {offsets = [0, 0], sizes = [8, 32], strides = [1, 1]} : vector<8x64xf32> to vector<8x32xf32>
    %c0_126 = arith.constant 0 : index
    %c0_127 = arith.constant 0 : index
    %c0_128 = arith.constant 0 : index
    %595 = vector.load %arg6[%c0_126, %c0_127, %c0_128] : memref<2x8x32xf32, #tpu.memory_space<vmem>>, vector<1x8x32xf32>
    %596 = vector.shape_cast %595 : vector<1x8x32xf32> to vector<8x32xf32>
    %597 = vector.shape_cast %594 : vector<8x32xf32> to vector<1x8x32xf32>
    tpu.vector_store %arg6[%c0_126, %c0_127, %c0_128], %597 {strides = array<i32>} : memref<2x8x32xf32, #tpu.memory_space<vmem>>, vector<1x8x32xf32>,
    %598 = vector.extract_strided_slice %585 {offsets = [0, 32], sizes = [8, 32], strides = [1, 1]} : vector<8x64xf32> to vector<8x32xf32>
    %c1_129 = arith.constant 1 : index
    %c0_130 = arith.constant 0 : index
    %c0_131 = arith.constant 0 : index
    %599 = vector.load %arg6[%c1_129, %c0_130, %c0_131] : memref<2x8x32xf32, #tpu.memory_space<vmem>>, vector<1x8x32xf32>
    %600 = vector.shape_cast %599 : vector<1x8x32xf32> to vector<8x32xf32>
    %601 = vector.shape_cast %598 : vector<8x32xf32> to vector<1x8x32xf32>
    tpu.vector_store %arg6[%c1_129, %c0_130, %c0_131], %601 {strides = array<i32>} : memref<2x8x32xf32, #tpu.memory_space<vmem>>, vector<1x8x32xf32>,
    return
  }
}

</mosaic_0001>

<bundles_post_ra>
// kernel: encoder_forward.1
= control target key start
LH: loop header
LB: loop body
LE: loop exit
PB: predicated region body
PF: predicated region fallthrough
CT: control target
= control target key end

     0   :  { %v1627_v3 = vmov 0.0   ;;  %vm48_vm0 = vcmask 261120   ;;  %v38_v33 = vlaneseq  ;;  %s1629_s11 = smov 32   ;;  %s1630_s12 = smov 96   ;;  %vm361_vm1 = vcmask 523520   ;;  %s2176_s1 = inlined_call_operand.vmem [shape: f32[32,256], index: 1, kind: input, shape index: {}]   ;;  %s2177_s2 = inlined_call_operand.vmem [shape: f32[64,256], index: 2, kind: input, shape index: {}]   ;;  %s2178_s0 = inlined_call_operand.vmem [shape: f32[64,32], index: 0, kind: input, shape index: {}]   ;;  %s2179_s3 = inlined_call_operand.vmem [shape: f32[1,256], index: 3, kind: input, shape index: {}]   ;;  %s2180_s4 = inlined_call_operand.vmem [shape: f32[64,64], index: 4, kind: output, shape index: {0}]   ;;  %s2181_s5 = inlined_call_operand.vmem [shape: f32[2,8,32], index: 5, kind: output, shape index: {1}]   ;;  %s2182_s6 = inlined_call_operand.vmem [shape: f32[2,8,32], index: 6, kind: output, shape index: {2}]  }
   0x1   :  { %v35_v0 = vld [vmem:[%s2176_s1 + $0x38] sm:$0xff]  ;;  %v34_v2 = vld [vmem:[%s2176_s1 + $0x30] sm:$0xff]  ;;  %137 = vmatprep.mubr.f32.mxu0 %v1627_v3  ;;  %286 = vmatprep.mubr.f32.mxu1 %v1627_v3  ;;  %v33_v5 = vld [vmem:[%s2176_s1 + $0x28] sm:$0xff]  ;;  %vm218_vm2 = vcmask 523264  }
   0x2   :  { %v1672_v1 = vld [vmem:[%s2177_s2 + $0x78] sm:$0xff]  ;;  %97 = vmatprep.subr.mxu0 %v35_v0  ;;  %v1683_v4 = vld [vmem:[%s2177_s2 + $0x70] sm:$0xff]  ;;  %v1691_v6 = vld [vmem:[%s2177_s2 + $0x68] sm:$0xff]  ;;  %v39_v34 = vshrl.u32 %v38_v33, 7 }
   0x3   :  { %238 = vmatprep.subr.mxu1 %v1672_v1  ;;  %98 = vmatpush1.msra.mxu0 %v34_v2  ;;  %v32_v7 = vld [vmem:[%s2176_s1 + $0x20] sm:$0xff]  ;;  %v31_v9 = vld [vmem:[%s2176_s1 + $0x18] sm:$0xff]  ;;  %v30_v11 = vld [vmem:[%s2176_s1 + $0x10] sm:$0xff] }
   0x4   :  { %239 = vmatpush1.msra.mxu1 %v1683_v4  ;;  %v1700_v8 = vld [vmem:[%s2177_s2 + $0x60] sm:$0xff]  ;;  %99 = vmatprep.subr.mxu0 %v33_v5  ;;  %v1709_v10 = vld [vmem:[%s2177_s2 + $0x58] sm:$0xff]  ;;  %v1717_v12 = vld [vmem:[%s2177_s2 + $0x50] sm:$0xff]  ;;  %v44_v35 = vsub.s32 1, %v39_v34  ;;  %v40_v37 = vsub.s32 0, %v39_v34 }
   0x5   :  { %240 = vmatprep.subr.mxu1 %v1691_v6  ;;  %100 = vmatpush1.msra.mxu0 %v32_v7  ;;  %v29_v13 = vld [vmem:[%s2176_s1 + $0x8] sm:$0xff]  ;;  %v28_v15 = vld [vmem:[%s2176_s1] sm:$0xff]  ;;  %v1744_v18 = vld [vmem:[%s2177_s2 + $0x38] sm:$0xff] }
   0x6   :  { %241 = vmatpush1.msra.mxu1 %v1700_v8  ;;  %v1726_v14 = vld [vmem:[%s2177_s2 + $0x48] sm:$0xff]  ;;  %101 = vmatprep.subr.mxu0 %v31_v9  ;;  %v1735_v16 = vld [vmem:[%s2177_s2 + $0x40] sm:$0xff]  ;;  %v1750_v19 = vld [vmem:[%s2177_s2 + $0x30] sm:$0xff] }
   0x7   :  { %242 = vmatprep.subr.mxu1 %v1709_v10  ;;  %102 = vmatpush1.msra.mxu0 %v30_v11  ;;  %v20_v17 = vld [vmem:[%s2178_s0] sm:$0xff]  ;;  %v1756_v20 = vld [vmem:[%s2177_s2 + $0x28] sm:$0xff]  ;;  %v1773_v23 = vld [vmem:[%s2177_s2 + $0x18] sm:$0xff] }
   0x8   :  { %243 = vmatpush1.msra.mxu1 %v1717_v12  ;;  %103 = vmatprep.subr.mxu0 %v29_v13  ;;  %v1763_v21 = vld [vmem:[%s2177_s2 + $0x20] sm:$0xff]  ;;  %v21_v22 = vld [vmem:[%s2178_s0 + $0x8] sm:$0xff]  ;;  %v1779_v24 = vld [vmem:[%s2177_s2 + $0x10] sm:$0xff] }
   0x9   :  { %244 = vmatprep.subr.mxu1 %v1726_v14  ;;  %104 = vmatpush1.msra.mxu0 %v28_v15  ;;  %v1786_v25 = vld [vmem:[%s2177_s2 + $0x8] sm:$0xff]  ;;  %v1794_v26 = vld [vmem:[%s2177_s2] sm:$0xff]  ;;  %v22_v27 = vld [vmem:[%s2178_s0 + $0x10] sm:$0xff] }
   0xa   :  { %245 = vmatpush1.msra.mxu1 %v1735_v16  ;;  %1448 = vmatmul.mubr.msk.f32.vlgmr.msra.gmra.mxu0 %vm48_vm0, %v20_v17  ;;  %v23_v28 = vld [vmem:[%s2178_s0 + $0x18] sm:$0xff]  ;;  %v24_v29 = vld [vmem:[%s2178_s0 + $0x20] sm:$0xff]  ;;  %v25_v30 = vld [vmem:[%s2178_s0 + $0x28] sm:$0xff] }
   0xb   :  { %246 = vmatprep.subr.mxu1 %v1744_v18  ;;  %143 = vmatprep.mubr.f32.mxu0 %v1627_v3  ;;  %v26_v31 = vld [vmem:[%s2178_s0 + $0x30] sm:$0xff]  ;;  %v27_v32 = vld [vmem:[%s2178_s0 + $0x38] sm:$0xff]  ;;  %v36_v36 = vld [vmem:[%s2179_s3] sm:$0x3]  ;;  %s1628_s3 = smov 64  }
   0xc   :  { %247 = vmatpush1.msra.mxu1 %v1750_v19  ;;  %542 = vmatprep.subr.mxu0 %v1672_v1  ;;  %v45_v38 = vrot.slane %v36_v36, %v44_v35  ;;  %v41_v41 = vrot.slane %v36_v36, %v40_v37 }
   0xd   :  { %248 = vmatprep.subr.mxu1 %v1756_v20  ;;  %543 = vmatpush1.msra.mxu0 %v1683_v4 }
   0xe   :  { %249 = vmatpush1.msra.mxu1 %v1763_v21  ;;  %1449 = vmatmul.mubr.msk.f32.gmra.mxu0 %vm48_vm0, %v21_v22 }
   0xf   :  { %250 = vmatprep.subr.mxu1 %v1773_v23  ;;  %149 = vmatprep.mubr.f32.mxu0 %v1627_v3 }
  0x10   :  { %251 = vmatpush1.msra.mxu1 %v1779_v24  ;;  %544 = vmatprep.subr.mxu0 %v1691_v6 }
  0x11   :  { %252 = vmatprep.subr.mxu1 %v1786_v25  ;;  %545 = vmatpush1.msra.mxu0 %v1700_v8 }
  0x12   :  { %253 = vmatpush1.msra.mxu1 %v1794_v26  ;;  %1450 = vmatmul.mubr.msk.f32.gmra.mxu0 %vm48_vm0, %v22_v27 }
  0x13   :  { %287 = vmatmul.mubr.f32.vlgmr.msra.gmra.mxu1 %v1627_v3  ;;  %155 = vmatprep.mubr.f32.mxu0 %v1627_v3 }
  0x14   :  { %388 = vmatprep.subr.mxu1 %v1672_v1  ;;  %436 = vmatprep.mubr.f32.mxu1 %v1627_v3 }
  0x15   :  { %389 = vmatpush1.msra.mxu1 %v1683_v4  ;;  %546 = vmatprep.subr.mxu0 %v1709_v10 }
  0x16   :  { %390 = vmatprep.subr.mxu1 %v1691_v6  ;;  %1451 = vmatmul.mubr.msk.f32.gmra.mxu0 %vm48_vm0, %v23_v28 }
  0x17   :  { %391 = vmatpush1.msra.mxu1 %v1700_v8  ;;  %161 = vmatprep.mubr.f32.mxu0 %v1627_v3 }
  0x18   :  { %392 = vmatprep.subr.mxu1 %v1709_v10  ;;  %547 = vmatpush1.msra.mxu0 %v1717_v12 }
  0x19   :  { %393 = vmatpush1.msra.mxu1 %v1717_v12  ;;  %548 = vmatprep.subr.mxu0 %v1726_v14 }
  0x1a   :  { %394 = vmatprep.subr.mxu1 %v1726_v14  ;;  %1452 = vmatmul.mubr.msk.f32.gmra.mxu0 %vm48_vm0, %v24_v29 }
  0x1b   :  { %395 = vmatpush1.msra.mxu1 %v1735_v16  ;;  %167 = vmatprep.mubr.f32.mxu0 %v1627_v3 }
  0x1c   :  { %396 = vmatprep.subr.mxu1 %v1744_v18  ;;  %549 = vmatpush1.msra.mxu0 %v1735_v16 }
  0x1d   :  { %397 = vmatpush1.msra.mxu1 %v1750_v19  ;;  %550 = vmatprep.subr.mxu0 %v1744_v18 }
  0x1e   :  { %398 = vmatprep.subr.mxu1 %v1756_v20  ;;  %1453 = vmatmul.mubr.msk.f32.gmra.mxu0 %vm48_vm0, %v25_v30 }
  0x1f   :  { %399 = vmatpush1.msra.mxu1 %v1763_v21  ;;  %173 = vmatprep.mubr.f32.mxu0 %v1627_v3 }
  0x20   :  { %400 = vmatprep.subr.mxu1 %v1773_v23  ;;  %551 = vmatpush1.msra.mxu0 %v1750_v19 }
  0x21   :  { %401 = vmatpush1.msra.mxu1 %v1779_v24  ;;  %552 = vmatprep.subr.mxu0 %v1756_v20 }
  0x22   :  { %402 = vmatprep.subr.mxu1 %v1786_v25  ;;  %1454 = vmatmul.mubr.msk.f32.gmra.mxu0 %vm48_vm0, %v26_v31 }
  0x23   :  { %403 = vmatpush1.msra.mxu1 %v1794_v26  ;;  %179 = vmatprep.mubr.f32.mxu0 %v1627_v3 }
  0x24   :  { %553 = vmatpush1.msra.mxu0 %v1763_v21  ;;  %696 = vmatprep.subr.mxu1 %v1672_v1 }
  0x25   :  { %554 = vmatprep.subr.mxu0 %v1773_v23 }
  0x26   :  { %555 = vmatpush1.msra.mxu0 %v1779_v24 }
  0x27   :  { %1455 = vmatmul.mubr.msk.f32.gmra.mxu0 %vm48_vm0, %v27_v32  ;;  %556 = vmatprep.subr.mxu0 %v1786_v25 }
  0x28   :  { %557 = vmatpush1.msra.mxu0 %v1794_v26  ;;  %590 = vmatprep.mubr.f32.mxu0 %v1627_v3 }
  0x29   :  { %850 = vmatprep.subr.mxu0 %v1672_v1 }
  0xca   :  { %v139_v39 = vpop.f32.mrf.mxu0 }
  0xcb   :  { %v140_v46 = vadd.f32 %v139_v39, %v41_v41 }
  0xcc   :  { %v141_v40 = vpop.f32.mrf.mxu0 }
  0xcd   :  { %v1867_v42 = vadd.f32 %v141_v40, %v45_v38 }
  0xce   :  { %v145_v43 = vpop.f32.mrf.mxu0 }
  0xcf   :  { %v1869_v44 = vadd.f32 %v145_v43, %v41_v41 }
  0xd0   :  { %v147_v45 = vpop.f32.mrf.mxu0 }
  0xd1   :  { %v1871_v47 = vadd.f32 %v147_v45, %v45_v38 }
  0xd2   :  { %v151_v48 = vpop.f32.mrf.mxu0 }
  0xd3   :  { %v288_v49 = vpop.f32.mrf.mxu1  ;;  %v1873_v50 = vadd.f32 %v151_v48, %v41_v41 }
  0xd4   :  { %v301_v51 = vadd.f32 %v288_v49, %v140_v46  ;;  %v153_v52 = vpop.f32.mrf.mxu0 }
  0xd5   :  { %v1875_v53 = vadd.f32 %v153_v52, %v45_v38  ;;  %v290_v28 = vpop.f32.mrf.mxu1 }
  0xd6   :  { %1499 = vtanh.f32 %v301_v51  ;;  %v157_v54 = vpop.f32.mrf.mxu0  ;;  %v1456_v31 = vmul.f32 -1.442695, %v301_v51 }
  0xd7   :  { %v1877_v55 = vadd.f32 %v157_v54, %v41_v41 }
  0xd8   :  { %v159_v56 = vpop.f32.mrf.mxu0 }
  0xd9   :  { %v1879_v57 = vadd.f32 %v159_v56, %v45_v38 }
  0xda   :  { %v163_v58 = vpop.f32.mrf.mxu0 }
  0xdb   :  { %v1881_v59 = vadd.f32 %v163_v58, %v41_v41 }
  0xdc   :  { %v165_v60 = vpop.f32.mrf.mxu0 }
  0xdd   :  { %v1883_v61 = vadd.f32 %v165_v60, %v45_v38 }
  0xde   :  { %v169_v62 = vpop.f32.mrf.mxu0 }
  0xdf   :  { %v1885_v63 = vadd.f32 %v169_v62, %v41_v41 }
  0xe0   :  { %v171_v0 = vpop.f32.mrf.mxu0 }
  0xe1   :  { %v1887_v2 = vadd.f32 %v171_v0, %v45_v38 }
  0xe2   :  { %v175_v7 = vpop.f32.mrf.mxu0 }
  0xe3   :  { %v1500_v5 = vpop.eup %1499  ;;  %v1889_v9 = vadd.f32 %v175_v7, %v41_v41 }
  0xe4   :  { %311 = vrot.lane.b32.xlu0 %v1500_v5, %s1628_s3  ;;  %v177_v11 = vpop.f32.mrf.mxu0 }
  0xe5   :  { %v1892_v13 = vadd.f32 %v177_v11, %v45_v38 }
  0xe7   :  { %v181_v15 = vpop.f32.mrf.mxu0 }
  0xe8   :  { %v1894_v17 = vadd.f32 %v181_v15, %v41_v41 }
  0xe9   :  { %v183_v22 = vpop.f32.mrf.mxu0 }
  0xea   :  { %v184_v27 = vadd.f32 %v183_v22, %v45_v38 }
  0xec   :  { %v326_v29 = vadd.f32 %v290_v28, %v184_v27 }
  0xee   :  { %1501 = vtanh.f32 %v326_v29  ;;  %v1457_v34 = vmul.f32 -1.442695, %v326_v29 }
  0xef   :  { %1503 = vpow2.f32 %v1456_v31 }
  0xfb   :  { %v1502_v30 = vpop.eup %1501 }
  0xfc   :  { %336 = vrot.lane.b32.xlu0 %v1502_v30, %s1628_s3  ;;  %v1504_v32 = vpop.eup %1503 }
  0xfd   :  { %v305_v33 = vadd.f32 1.0, %v1504_v32 }
  0xff   :  { %1505 = vrcp.f32 %v305_v33 }
 0x100   :  { %1507 = vpow2.f32 %v1457_v34 }
 0x10c   :  { %v1506_v35 = vpop.eup %1505 }
 0x10d   :  { %v1508_v38 = vpop.eup %1507  ;;  %v309_v45 = vmul.f32 0.0, %v1506_v35 }
 0x10e   :  { %v330_v39 = vadd.f32 1.0, %v1508_v38 }
 0x110   :  { %1509 = vrcp.f32 %v330_v39 }
 0x11d   :  { %v1510_v40 = vpop.eup %1509 }
 0x11e   :  { %v334_v51 = vmul.f32 0.0, %v1510_v40 }
 0x156   :  { %v312_v36 = vpop.permute.xlu0 %311 }
 0x157   :  { %v314_v37 = vmul.f32 %v1506_v35, %v312_v36 }
 0x159   :  { %316 = vrot.lane.b32.xlu1 %v314_v37, %s1629_s11 }
 0x16e   :  { %v337_v41 = vpop.permute.xlu0 %336 }
 0x16f   :  { %v339_v43 = vmul.f32 %v1510_v40, %v337_v41 }
 0x171   :  { %341 = vrot.lane.b32.xlu1 %v339_v43, %s1629_s11 }
 0x1cb   :  { %v317_v46 = vpop.permute.xlu1 %316 }
 0x1cc   :  { %v319_v48 = vadd.f32 %v317_v46, %v309_v45 }
 0x1ce   :  { %1511 = vtanh.f32 %v319_v48 }
 0x1db   :  { %v1512_v49 = vpop.eup %1511 }
 0x1dc   :  { %322 = vrot.lane.b32.xlu0 %v1512_v49, %s1628_s3 }
 0x1e3   :  { %v342_v52 = vpop.permute.xlu1 %341 }
 0x1e4   :  { %v344_v54 = vadd.f32 %v342_v52, %v334_v51 }
 0x1e6   :  { %1513 = vtanh.f32 %v344_v54 }
 0x1f3   :  { %v1514_v56 = vpop.eup %1513 }
 0x1f4   :  { %347 = vrot.lane.b32.xlu1 %v1514_v56, %s1628_s3 }
 0x24e   :  { %v323_v58 = vpop.permute.xlu0 %322 }
 0x24f   :  { %v325_v60 = vmul.f32 %v1506_v35, %v323_v58 }
 0x251   :  { %352 = vrot.lane.b32.xlu0 %v325_v60, %s1629_s11 }
 0x255   :  { %365 = vrot.lane.b32.xlu0 %v319_v48, %s1630_s12 }
 0x266   :  { %v348_v62 = vpop.permute.xlu1 %347 }
 0x267   :  { %v350_v0 = vmul.f32 %v1510_v40, %v348_v62 }
 0x269   :  { %357 = vrot.lane.b32.xlu1 %v350_v0, %s1628_s3 }
 0x2c3   :  { %v353_v5 = vpop.permute.xlu0 %352 }
 0x2c4   :  { %355 = vst.msk [vmem:[%s2180_s4] sm:$0xff] %vm48_vm0, %v353_v5 }
 0x2c7   :  { %v366_v30 = vpop.permute.xlu0 %365 }
 0x2c8   :  { %v368_v32 = vsel %vm48_vm0, %v366_v30, %v344_v54 }
 0x2db   :  { %v358_v7 = vpop.permute.xlu1 %357 }
 0x2dc   :  { %1458 = vst.msk [vmem:[%s2180_s4 + $0x38] sm:$0xff] %vm361_vm1, %v358_v7  ;;  %v363_v11 = vsel %vm48_vm0, %v353_v5, %v358_v7 }
 0x2dd   :  { %1459 = vmatmul.mubr.msk.f32.vlgmr.msra.gmra.mxu1 %vm218_vm2, %v363_v11 }
 0x2de   :  { %697 = vmatpush1.msra.mxu1 %v1683_v4  ;;  %744 = vmatprep.mubr.f32.mxu1 %v1627_v3 }
 0x2df   :  { %698 = vmatprep.subr.mxu1 %v1691_v6 }
 0x2e0   :  { %699 = vmatpush1.msra.mxu1 %v1700_v8 }
 0x2e1   :  { %700 = vmatprep.subr.mxu1 %v1709_v10 }
 0x2e2   :  { %701 = vmatpush1.msra.mxu1 %v1717_v12 }
 0x2e3   :  { %702 = vmatprep.subr.mxu1 %v1726_v14 }
 0x2e4   :  { %703 = vmatpush1.msra.mxu1 %v1735_v16 }
 0x2e5   :  { %704 = vmatprep.subr.mxu1 %v1744_v18 }
 0x2e6   :  { %705 = vmatpush1.msra.mxu1 %v1750_v19 }
 0x2e7   :  { %706 = vmatprep.subr.mxu1 %v1756_v20 }
 0x2e8   :  { %707 = vmatpush1.msra.mxu1 %v1763_v21 }
 0x2e9   :  { %708 = vmatprep.subr.mxu1 %v1773_v23 }
 0x2ea   :  { %709 = vmatpush1.msra.mxu1 %v1779_v24 }
 0x2eb   :  { %710 = vmatprep.subr.mxu1 %v1786_v25 }
 0x2ec   :  { %711 = vmatpush1.msra.mxu1 %v1794_v26 }
 0x2ed   :  { %996 = vmatprep.subr.mxu1 %v1672_v1 }
 0x39d   :  { %v438_v15 = vpop.f32.mrf.mxu1 }
 0x39e   :  { %v451_v22 = vadd.f32 %v438_v15, %v1869_v44 }
 0x39f   :  { %v440_v27 = vpop.f32.mrf.mxu1 }
 0x3a0   :  { %1515 = vtanh.f32 %v451_v22  ;;  %v480_v28 = vadd.f32 %v440_v27, %v1892_v13  ;;  %v1460_v33 = vmul.f32 -1.442695, %v451_v22 }
 0x3a2   :  { %1517 = vtanh.f32 %v480_v28  ;;  %v1461_v34 = vmul.f32 -1.442695, %v480_v28 }
 0x3a3   :  { %1519 = vpow2.f32 %v1460_v33 }
 0x3a4   :  { %1521 = vpow2.f32 %v1461_v34 }
 0x3ad   :  { %v1516_v29 = vpop.eup %1515 }
 0x3ae   :  { %465 = vrot.lane.b32.xlu1 %v1516_v29, %s1628_s3 }
 0x3af   :  { %v1518_v31 = vpop.eup %1517 }
 0x3b0   :  { %490 = vrot.lane.b32.xlu0 %v1518_v31, %s1628_s3  ;;  %v1520_v44 = vpop.eup %1519 }
 0x3b1   :  { %v1522_v35 = vpop.eup %1521  ;;  %v455_v36 = vadd.f32 1.0, %v1520_v44 }
 0x3b2   :  { %460 = vrot.lane.b32.xlu1 %v368_v32, %s1629_s11  ;;  %v484_v13 = vadd.f32 1.0, %v1522_v35 }
 0x3b3   :  { %1523 = vrcp.f32 %v455_v36 }
 0x3b4   :  { %1525 = vrcp.f32 %v484_v13 }
 0x3c0   :  { %v1524_v37 = vpop.eup %1523 }
 0x3c1   :  { %v1526_v40 = vpop.eup %1525 }
 0x3c2   :  { %v488_v51 = vmul.f32 %v1526_v40, %v368_v32 }
 0x420   :  { %v466_v38 = vpop.permute.xlu1 %465 }
 0x421   :  { %v468_v39 = vmul.f32 %v1524_v37, %v466_v38 }
 0x422   :  { %v491_v41 = vpop.permute.xlu0 %490 }
 0x423   :  { %470 = vrot.lane.b32.xlu0 %v468_v39, %s1629_s11  ;;  %v493_v43 = vmul.f32 %v1526_v40, %v491_v41 }
 0x424   :  { %v461_v45 = vpop.permute.xlu1 %460 }
 0x425   :  { %495 = vrot.lane.b32.xlu1 %v493_v43, %s1629_s11  ;;  %v463_v46 = vmul.f32 %v1524_v37, %v461_v45 }
 0x495   :  { %v471_v48 = vpop.permute.xlu0 %470 }
 0x496   :  { %v473_v49 = vadd.f32 %v471_v48, %v463_v46 }
 0x497   :  { %v496_v52 = vpop.permute.xlu1 %495 }
 0x498   :  { %1527 = vtanh.f32 %v473_v49  ;;  %v498_v54 = vadd.f32 %v496_v52, %v488_v51 }
 0x49a   :  { %1529 = vtanh.f32 %v498_v54 }
 0x4a5   :  { %v1528_v56 = vpop.eup %1527 }
 0x4a6   :  { %476 = vrot.lane.b32.xlu0 %v1528_v56, %s1628_s3 }
 0x4a7   :  { %v1530_v58 = vpop.eup %1529 }
 0x4a8   :  { %501 = vrot.lane.b32.xlu1 %v1530_v58, %s1628_s3 }
 0x518   :  { %v477_v60 = vpop.permute.xlu0 %476 }
 0x519   :  { %v479_v62 = vmul.f32 %v1524_v37, %v477_v60 }
 0x51a   :  { %v502_v0 = vpop.permute.xlu1 %501 }
 0x51b   :  { %506 = vrot.lane.b32.xlu0 %v479_v62, %s1629_s11  ;;  %v504_v5 = vmul.f32 %v1526_v40, %v502_v0 }
 0x51d   :  { %512 = vrot.lane.b32.xlu1 %v504_v5, %s1628_s3 }
 0x51f   :  { %519 = vrot.lane.b32.xlu0 %v473_v49, %s1630_s12 }
 0x58d   :  { %v507_v7 = vpop.permute.xlu0 %506 }
 0x58e   :  { %1462 = vst.msk [vmem:[%s2180_s4 + $0x8] sm:$0xff] %vm48_vm0, %v507_v7 }
 0x58f   :  { %v513_v11 = vpop.permute.xlu1 %512 }
 0x590   :  { %1463 = vst.msk [vmem:[%s2180_s4 + $0x30] sm:$0xff] %vm361_vm1, %v513_v11  ;;  %v517_v15 = vsel %vm48_vm0, %v507_v7, %v513_v11 }
 0x591   :  { %1464 = vmatmul.mubr.msk.f32.vlgmr.msra.gmra.mxu0 %vm218_vm2, %v517_v15  ;;  %v520_v31 = vpop.permute.xlu0 %519 }
 0x592   :  { %851 = vmatpush1.msra.mxu0 %v1683_v4  ;;  %898 = vmatprep.mubr.f32.mxu0 %v1627_v3  ;;  %v522_v33 = vsel %vm48_vm0, %v520_v31, %v498_v54 }
 0x593   :  { %852 = vmatprep.subr.mxu0 %v1691_v6 }
 0x594   :  { %853 = vmatpush1.msra.mxu0 %v1700_v8 }
 0x595   :  { %854 = vmatprep.subr.mxu0 %v1709_v10 }
 0x596   :  { %855 = vmatpush1.msra.mxu0 %v1717_v12 }
 0x597   :  { %856 = vmatprep.subr.mxu0 %v1726_v14 }
 0x598   :  { %857 = vmatpush1.msra.mxu0 %v1735_v16 }
 0x599   :  { %858 = vmatprep.subr.mxu0 %v1744_v18 }
 0x59a   :  { %859 = vmatpush1.msra.mxu0 %v1750_v19 }
 0x59b   :  { %860 = vmatprep.subr.mxu0 %v1756_v20 }
 0x59c   :  { %861 = vmatpush1.msra.mxu0 %v1763_v21 }
 0x59d   :  { %862 = vmatprep.subr.mxu0 %v1773_v23 }
 0x59e   :  { %863 = vmatpush1.msra.mxu0 %v1779_v24 }
 0x59f   :  { %864 = vmatprep.subr.mxu0 %v1786_v25 }
 0x5a0   :  { %865 = vmatpush1.msra.mxu0 %v1794_v26 }
 0x5a1   :  { %1142 = vmatprep.subr.mxu0 %v1672_v1 }
 0x651   :  { %v592_v22 = vpop.f32.mrf.mxu0 }
 0x652   :  { %v605_v27 = vadd.f32 %v592_v22, %v1873_v50 }
 0x653   :  { %v594_v28 = vpop.f32.mrf.mxu0 }
 0x654   :  { %1531 = vtanh.f32 %v605_v27  ;;  %v634_v29 = vadd.f32 %v594_v28, %v1887_v2  ;;  %v1465_v34 = vmul.f32 -1.442695, %v605_v27 }
 0x656   :  { %1533 = vtanh.f32 %v634_v29  ;;  %v1466_v44 = vmul.f32 -1.442695, %v634_v29 }
 0x657   :  { %1535 = vpow2.f32 %v1465_v34 }
 0x658   :  { %1537 = vpow2.f32 %v1466_v44 }
 0x661   :  { %v1532_v30 = vpop.eup %1531 }
 0x662   :  { %619 = vrot.lane.b32.xlu1 %v1532_v30, %s1628_s3 }
 0x663   :  { %v1534_v32 = vpop.eup %1533 }
 0x664   :  { %644 = vrot.lane.b32.xlu0 %v1534_v32, %s1628_s3  ;;  %v1536_v50 = vpop.eup %1535 }
 0x665   :  { %v1538_v35 = vpop.eup %1537  ;;  %v609_v36 = vadd.f32 1.0, %v1536_v50 }
 0x666   :  { %614 = vrot.lane.b32.xlu1 %v522_v33, %s1629_s11  ;;  %v638_v2 = vadd.f32 1.0, %v1538_v35 }
 0x667   :  { %1539 = vrcp.f32 %v609_v36 }
 0x668   :  { %1541 = vrcp.f32 %v638_v2 }
 0x674   :  { %v1540_v13 = vpop.eup %1539 }
 0x675   :  { %v1542_v39 = vpop.eup %1541 }
 0x676   :  { %v642_v49 = vmul.f32 %v1542_v39, %v522_v33 }
 0x6d4   :  { %v620_v37 = vpop.permute.xlu1 %619 }
 0x6d5   :  { %v622_v38 = vmul.f32 %v1540_v13, %v620_v37 }
 0x6d6   :  { %v645_v40 = vpop.permute.xlu0 %644 }
 0x6d7   :  { %624 = vrot.lane.b32.xlu0 %v622_v38, %s1629_s11  ;;  %v647_v41 = vmul.f32 %v1542_v39, %v645_v40 }
 0x6d8   :  { %v615_v43 = vpop.permute.xlu1 %614 }
 0x6d9   :  { %649 = vrot.lane.b32.xlu1 %v647_v41, %s1629_s11  ;;  %v617_v45 = vmul.f32 %v1540_v13, %v615_v43 }
 0x749   :  { %v625_v46 = vpop.permute.xlu0 %624 }
 0x74a   :  { %v627_v48 = vadd.f32 %v625_v46, %v617_v45 }
 0x74b   :  { %v650_v51 = vpop.permute.xlu1 %649 }
 0x74c   :  { %1543 = vtanh.f32 %v627_v48  ;;  %v652_v52 = vadd.f32 %v650_v51, %v642_v49 }
 0x74e   :  { %1545 = vtanh.f32 %v652_v52 }
 0x759   :  { %v1544_v54 = vpop.eup %1543 }
 0x75a   :  { %630 = vrot.lane.b32.xlu0 %v1544_v54, %s1628_s3 }
 0x75b   :  { %v1546_v56 = vpop.eup %1545 }
 0x75c   :  { %655 = vrot.lane.b32.xlu1 %v1546_v56, %s1628_s3 }
 0x7cc   :  { %v631_v58 = vpop.permute.xlu0 %630 }
 0x7cd   :  { %v633_v60 = vmul.f32 %v1540_v13, %v631_v58 }
 0x7ce   :  { %v656_v62 = vpop.permute.xlu1 %655 }
 0x7cf   :  { %660 = vrot.lane.b32.xlu0 %v633_v60, %s1629_s11  ;;  %v658_v0 = vmul.f32 %v1542_v39, %v656_v62 }
 0x7d1   :  { %666 = vrot.lane.b32.xlu1 %v658_v0, %s1628_s3 }
 0x7d3   :  { %673 = vrot.lane.b32.xlu0 %v627_v48, %s1630_s12 }
 0x841   :  { %v661_v5 = vpop.permute.xlu0 %660 }
 0x842   :  { %1467 = vst.msk [vmem:[%s2180_s4 + $0x10] sm:$0xff] %vm48_vm0, %v661_v5 }
 0x843   :  { %v667_v7 = vpop.permute.xlu1 %666 }
 0x844   :  { %1468 = vst.msk [vmem:[%s2180_s4 + $0x28] sm:$0xff] %vm361_vm1, %v667_v7  ;;  %v671_v11 = vsel %vm48_vm0, %v661_v5, %v667_v7 }
 0x845   :  { %1469 = vmatmul.mubr.msk.f32.vlgmr.msra.gmra.mxu1 %vm218_vm2, %v671_v11  ;;  %v674_v30 = vpop.permute.xlu0 %673 }
 0x846   :  { %997 = vmatpush1.msra.mxu1 %v1683_v4  ;;  %1044 = vmatprep.mubr.f32.mxu1 %v1627_v3  ;;  %v676_v32 = vsel %vm48_vm0, %v674_v30, %v652_v52 }
 0x847   :  { %998 = vmatprep.subr.mxu1 %v1691_v6 }
 0x848   :  { %999 = vmatpush1.msra.mxu1 %v1700_v8 }
 0x849   :  { %1000 = vmatprep.subr.mxu1 %v1709_v10 }
 0x84a   :  { %1001 = vmatpush1.msra.mxu1 %v1717_v12 }
 0x84b   :  { %1002 = vmatprep.subr.mxu1 %v1726_v14 }
 0x84c   :  { %1003 = vmatpush1.msra.mxu1 %v1735_v16 }
 0x84d   :  { %1004 = vmatprep.subr.mxu1 %v1744_v18 }
 0x84e   :  { %1005 = vmatpush1.msra.mxu1 %v1750_v19 }
 0x84f   :  { %1006 = vmatprep.subr.mxu1 %v1756_v20 }
 0x850   :  { %1007 = vmatpush1.msra.mxu1 %v1763_v21 }
 0x851   :  { %1008 = vmatprep.subr.mxu1 %v1773_v23 }
 0x852   :  { %1009 = vmatpush1.msra.mxu1 %v1779_v24 }
 0x853   :  { %1010 = vmatprep.subr.mxu1 %v1786_v25 }
 0x854   :  { %1011 = vmatpush1.msra.mxu1 %v1794_v26 }
 0x855   :  { %1288 = vmatprep.subr.mxu1 %v1672_v1 }
 0x905   :  { %v746_v15 = vpop.f32.mrf.mxu1 }
 0x906   :  { %v759_v22 = vadd.f32 %v746_v15, %v1877_v55 }
 0x907   :  { %v748_v27 = vpop.f32.mrf.mxu1 }
 0x908   :  { %1547 = vtanh.f32 %v759_v22  ;;  %v788_v28 = vadd.f32 %v748_v27, %v1883_v61  ;;  %v1470_v1 = vmul.f32 -1.442695, %v759_v22 }
 0x90a   :  { %1549 = vtanh.f32 %v788_v28  ;;  %v1471_v33 = vmul.f32 -1.442695, %v788_v28 }
 0x90b   :  { %1551 = vpow2.f32 %v1470_v1 }
 0x90c   :  { %1553 = vpow2.f32 %v1471_v33 }
 0x915   :  { %v1548_v29 = vpop.eup %1547 }
 0x916   :  { %773 = vrot.lane.b32.xlu1 %v1548_v29, %s1628_s3 }
 0x917   :  { %v1550_v31 = vpop.eup %1549 }
 0x918   :  { %798 = vrot.lane.b32.xlu0 %v1550_v31, %s1628_s3  ;;  %v1552_v55 = vpop.eup %1551 }
 0x919   :  { %v1554_v34 = vpop.eup %1553  ;;  %v763_v44 = vadd.f32 1.0, %v1552_v55 }
 0x91a   :  { %768 = vrot.lane.b32.xlu1 %v676_v32, %s1629_s11  ;;  %v792_v61 = vadd.f32 1.0, %v1554_v34 }
 0x91b   :  { %1555 = vrcp.f32 %v763_v44 }
 0x91c   :  { %1557 = vrcp.f32 %v792_v61 }
 0x928   :  { %v1556_v50 = vpop.eup %1555 }
 0x929   :  { %v1558_v2 = vpop.eup %1557 }
 0x92a   :  { %v796_v43 = vmul.f32 %v1558_v2, %v676_v32 }
 0x988   :  { %v774_v35 = vpop.permute.xlu1 %773 }
 0x989   :  { %v776_v36 = vmul.f32 %v1556_v50, %v774_v35 }
 0x98a   :  { %v799_v13 = vpop.permute.xlu0 %798 }
 0x98b   :  { %778 = vrot.lane.b32.xlu0 %v776_v36, %s1629_s11  ;;  %v801_v37 = vmul.f32 %v1558_v2, %v799_v13 }
 0x98c   :  { %v769_v38 = vpop.permute.xlu1 %768 }
 0x98d   :  { %803 = vrot.lane.b32.xlu1 %v801_v37, %s1629_s11  ;;  %v771_v39 = vmul.f32 %v1556_v50, %v769_v38 }
 0x9fd   :  { %v779_v40 = vpop.permute.xlu0 %778 }
 0x9fe   :  { %v781_v41 = vadd.f32 %v779_v40, %v771_v39 }
 0x9ff   :  { %v804_v45 = vpop.permute.xlu1 %803 }
 0xa00   :  { %1559 = vtanh.f32 %v781_v41  ;;  %v806_v46 = vadd.f32 %v804_v45, %v796_v43 }
 0xa02   :  { %1561 = vtanh.f32 %v806_v46 }
 0xa0d   :  { %v1560_v48 = vpop.eup %1559 }
 0xa0e   :  { %784 = vrot.lane.b32.xlu0 %v1560_v48, %s1628_s3 }
 0xa0f   :  { %v1562_v49 = vpop.eup %1561 }
 0xa10   :  { %809 = vrot.lane.b32.xlu1 %v1562_v49, %s1628_s3 }
 0xa80   :  { %v785_v51 = vpop.permute.xlu0 %784 }
 0xa81   :  { %v787_v52 = vmul.f32 %v1556_v50, %v785_v51 }
 0xa82   :  { %v810_v54 = vpop.permute.xlu1 %809 }
 0xa83   :  { %814 = vrot.lane.b32.xlu0 %v787_v52, %s1629_s11  ;;  %v812_v56 = vmul.f32 %v1558_v2, %v810_v54 }
 0xa85   :  { %820 = vrot.lane.b32.xlu1 %v812_v56, %s1628_s3 }
 0xa87   :  { %827 = vrot.lane.b32.xlu0 %v781_v41, %s1630_s12 }
 0xaf5   :  { %v815_v58 = vpop.permute.xlu0 %814 }
 0xaf6   :  { %1472 = vst.msk [vmem:[%s2180_s4 + $0x18] sm:$0xff] %vm48_vm0, %v815_v58 }
 0xaf7   :  { %v821_v60 = vpop.permute.xlu1 %820 }
 0xaf8   :  { %1473 = vst.msk [vmem:[%s2180_s4 + $0x20] sm:$0xff] %vm361_vm1, %v821_v60  ;;  %v825_v62 = vsel %vm48_vm0, %v815_v58, %v821_v60 }
 0xaf9   :  { %1474 = vmatmul.mubr.msk.f32.vlgmr.msra.gmra.mxu0 %vm218_vm2, %v825_v62  ;;  %v828_v22 = vpop.permute.xlu0 %827 }
 0xafa   :  { %1143 = vmatpush1.msra.mxu0 %v1683_v4  ;;  %1190 = vmatprep.mubr.f32.mxu0 %v1627_v3  ;;  %v830_v28 = vsel %vm48_vm0, %v828_v22, %v806_v46 }
 0xafb   :  { %1144 = vmatprep.subr.mxu0 %v1691_v6 }
 0xafc   :  { %1145 = vmatpush1.msra.mxu0 %v1700_v8 }
 0xafd   :  { %1146 = vmatprep.subr.mxu0 %v1709_v10 }
 0xafe   :  { %1147 = vmatpush1.msra.mxu0 %v1717_v12 }
 0xaff   :  { %1148 = vmatprep.subr.mxu0 %v1726_v14 }
 0xb00   :  { %1149 = vmatpush1.msra.mxu0 %v1735_v16 }
 0xb01   :  { %1150 = vmatprep.subr.mxu0 %v1744_v18 }
 0xb02   :  { %1151 = vmatpush1.msra.mxu0 %v1750_v19 }
 0xb03   :  { %1152 = vmatprep.subr.mxu0 %v1756_v20 }
 0xb04   :  { %1153 = vmatpush1.msra.mxu0 %v1763_v21 }
 0xb05   :  { %1154 = vmatprep.subr.mxu0 %v1773_v23 }
 0xb06   :  { %1155 = vmatpush1.msra.mxu0 %v1779_v24 }
 0xb07   :  { %1156 = vmatprep.subr.mxu0 %v1786_v25 }
 0xb08   :  { %1157 = vmatpush1.msra.mxu0 %v1794_v26 }
 0xbb9   :  { %v900_v0 = vpop.f32.mrf.mxu0 }
 0xbba   :  { %v907_v5 = vadd.f32 %v900_v0, %v1881_v59 }
 0xbbb   :  { %v902_v7 = vpop.f32.mrf.mxu0 }
 0xbbc   :  { %1563 = vtanh.f32 %v907_v5  ;;  %v936_v11 = vadd.f32 %v902_v7, %v1879_v57  ;;  %v1475_v29 = vmul.f32 -1.442695, %v907_v5 }
 0xbbe   :  { %1565 = vtanh.f32 %v936_v11  ;;  %v1476_v30 = vmul.f32 -1.442695, %v936_v11 }
 0xbbf   :  { %1567 = vpow2.f32 %v1475_v29 }
 0xbc0   :  { %1569 = vpow2.f32 %v1476_v30 }
 0xbc9   :  { %v1564_v15 = vpop.eup %1563 }
 0xbca   :  { %921 = vrot.lane.b32.xlu1 %v1564_v15, %s1628_s3 }
 0xbcb   :  { %v1566_v27 = vpop.eup %1565 }
 0xbcc   :  { %946 = vrot.lane.b32.xlu0 %v1566_v27, %s1628_s3  ;;  %v1568_v59 = vpop.eup %1567 }
 0xbcd   :  { %v1570_v31 = vpop.eup %1569  ;;  %v911_v32 = vadd.f32 1.0, %v1568_v59 }
 0xbce   :  { %916 = vrot.lane.b32.xlu1 %v830_v28, %s1629_s11  ;;  %v940_v57 = vadd.f32 1.0, %v1570_v31 }
 0xbcf   :  { %1571 = vrcp.f32 %v911_v32 }
 0xbd0   :  { %1573 = vrcp.f32 %v940_v57 }
 0xbdc   :  { %v1572_v1 = vpop.eup %1571 }
 0xbdd   :  { %v1574_v34 = vpop.eup %1573 }
 0xbde   :  { %v944_v13 = vmul.f32 %v1574_v34, %v830_v28 }
 0xc3c   :  { %v922_v33 = vpop.permute.xlu1 %921 }
 0xc3d   :  { %v924_v55 = vmul.f32 %v1572_v1, %v922_v33 }
 0xc3e   :  { %v947_v44 = vpop.permute.xlu0 %946 }
 0xc3f   :  { %926 = vrot.lane.b32.xlu0 %v924_v55, %s1629_s11  ;;  %v949_v61 = vmul.f32 %v1574_v34, %v947_v44 }
 0xc40   :  { %v917_v50 = vpop.permute.xlu1 %916 }
 0xc41   :  { %951 = vrot.lane.b32.xlu1 %v949_v61, %s1629_s11  ;;  %v919_v35 = vmul.f32 %v1572_v1, %v917_v50 }
 0xcb1   :  { %v927_v36 = vpop.permute.xlu0 %926 }
 0xcb2   :  { %v929_v2 = vadd.f32 %v927_v36, %v919_v35 }
 0xcb3   :  { %v952_v37 = vpop.permute.xlu1 %951 }
 0xcb4   :  { %1575 = vtanh.f32 %v929_v2  ;;  %v954_v38 = vadd.f32 %v952_v37, %v944_v13 }
 0xcb6   :  { %1577 = vtanh.f32 %v954_v38 }
 0xcc1   :  { %v1576_v39 = vpop.eup %1575 }
 0xcc2   :  { %932 = vrot.lane.b32.xlu0 %v1576_v39, %s1628_s3 }
 0xcc3   :  { %v1578_v40 = vpop.eup %1577 }
 0xcc4   :  { %957 = vrot.lane.b32.xlu1 %v1578_v40, %s1628_s3 }
 0xd34   :  { %v933_v41 = vpop.permute.xlu0 %932 }
 0xd35   :  { %v935_v43 = vmul.f32 %v1572_v1, %v933_v41 }
 0xd36   :  { %v958_v45 = vpop.permute.xlu1 %957 }
 0xd37   :  { %962 = vrot.lane.b32.xlu0 %v935_v43, %s1629_s11  ;;  %v960_v46 = vmul.f32 %v1574_v34, %v958_v45 }
 0xd39   :  { %967 = vrot.lane.b32.xlu1 %v960_v46, %s1628_s3 }
 0xd3b   :  { %973 = vrot.lane.b32.xlu0 %v929_v2, %s1630_s12 }
 0xda9   :  { %v963_v48 = vpop.permute.xlu0 %962 }
 0xdaa   :  { %1477 = vst.msk [vmem:[%s2180_s4 + $0x20] sm:$0xff] %vm48_vm0, %v963_v48 }
 0xdab   :  { %v968_v49 = vpop.permute.xlu1 %967 }
 0xdac   :  { %1478 = vst.msk [vmem:[%s2180_s4 + $0x18] sm:$0xff] %vm361_vm1, %v968_v49  ;;  %v971_v51 = vsel %vm48_vm0, %v963_v48, %v968_v49 }
 0xdad   :  { %1479 = vmatmul.mubr.msk.f32.vlgmr.msra.gmra.mxu1 %vm218_vm2, %v971_v51 }
 0xdae   :  { %1289 = vmatpush1.msra.mxu1 %v1683_v4  ;;  %1336 = vmatprep.mubr.f32.mxu1 %v1627_v3 }
 0xdaf   :  { %1290 = vmatprep.subr.mxu1 %v1691_v6 }
 0xdb0   :  { %1291 = vmatpush1.msra.mxu1 %v1700_v8 }
 0xdb1   :  { %1292 = vmatprep.subr.mxu1 %v1709_v10 }
 0xdb2   :  { %1293 = vmatpush1.msra.mxu1 %v1717_v12  ;;  %v974_v12 = vpop.permute.xlu0 %973 }
 0xdb3   :  { %1294 = vmatprep.subr.mxu1 %v1726_v14 }
 0xdb4   :  { %1295 = vmatpush1.msra.mxu1 %v1735_v16  ;;  %v976_v16 = vsel %vm48_vm0, %v974_v12, %v954_v38 }
 0xdb5   :  { %1296 = vmatprep.subr.mxu1 %v1744_v18 }
 0xdb6   :  { %1297 = vmatpush1.msra.mxu1 %v1750_v19 }
 0xdb7   :  { %1298 = vmatprep.subr.mxu1 %v1756_v20 }
 0xdb8   :  { %1299 = vmatpush1.msra.mxu1 %v1763_v21 }
 0xdb9   :  { %1300 = vmatprep.subr.mxu1 %v1773_v23 }
 0xdba   :  { %1301 = vmatpush1.msra.mxu1 %v1779_v24 }
 0xdbb   :  { %1302 = vmatprep.subr.mxu1 %v1786_v25 }
 0xdbc   :  { %1303 = vmatpush1.msra.mxu1 %v1794_v26 }
 0xe6d   :  { %v1046_v3 = vpop.f32.mrf.mxu1 }
 0xe6e   :  { %v1053_v4 = vadd.f32 %v1046_v3, %v1885_v63 }
 0xe6f   :  { %v1048_v6 = vpop.f32.mrf.mxu1 }
 0xe70   :  { %1579 = vtanh.f32 %v1053_v4  ;;  %v1082_v8 = vadd.f32 %v1048_v6, %v1875_v53  ;;  %v1480_v18 = vmul.f32 -1.442695, %v1053_v4 }
 0xe72   :  { %1581 = vtanh.f32 %v1082_v8  ;;  %v1481_v19 = vmul.f32 -1.442695, %v1082_v8 }
 0xe73   :  { %1583 = vpow2.f32 %v1480_v18 }
 0xe74   :  { %1585 = vpow2.f32 %v1481_v19 }
 0xe7d   :  { %v1580_v10 = vpop.eup %1579 }
 0xe7e   :  { %1067 = vrot.lane.b32.xlu1 %v1580_v10, %s1628_s3 }
 0xe7f   :  { %v1582_v14 = vpop.eup %1581 }
 0xe80   :  { %1092 = vrot.lane.b32.xlu0 %v1582_v14, %s1628_s3  ;;  %v1584_v20 = vpop.eup %1583 }
 0xe81   :  { %v1586_v21 = vpop.eup %1585  ;;  %v1057_v23 = vadd.f32 1.0, %v1584_v20 }
 0xe82   :  { %1062 = vrot.lane.b32.xlu1 %v976_v16, %s1629_s11  ;;  %v1086_v24 = vadd.f32 1.0, %v1586_v21 }
 0xe83   :  { %1587 = vrcp.f32 %v1057_v23 }
 0xe84   :  { %1589 = vrcp.f32 %v1086_v24 }
 0xe90   :  { %v1588_v25 = vpop.eup %1587 }
 0xe91   :  { %v1590_v63 = vpop.eup %1589 }
 0xe92   :  { %v1090_v0 = vmul.f32 %v1590_v63, %v976_v16 }
 0xef0   :  { %v1068_v26 = vpop.permute.xlu1 %1067 }
 0xef1   :  { %v1070_v53 = vmul.f32 %v1588_v25, %v1068_v26 }
 0xef2   :  { %v1093_v52 = vpop.permute.xlu0 %1092 }
 0xef3   :  { %1072 = vrot.lane.b32.xlu0 %v1070_v53, %s1629_s11  ;;  %v1095_v54 = vmul.f32 %v1590_v63, %v1093_v52 }
 0xef4   :  { %v1063_v56 = vpop.permute.xlu1 %1062 }
 0xef5   :  { %1097 = vrot.lane.b32.xlu1 %v1095_v54, %s1629_s11  ;;  %v1065_v58 = vmul.f32 %v1588_v25, %v1063_v56 }
 0xf65   :  { %v1073_v60 = vpop.permute.xlu0 %1072 }
 0xf66   :  { %v1075_v62 = vadd.f32 %v1073_v60, %v1065_v58 }
 0xf67   :  { %v1098_v5 = vpop.permute.xlu1 %1097 }
 0xf68   :  { %1591 = vtanh.f32 %v1075_v62  ;;  %v1100_v7 = vadd.f32 %v1098_v5, %v1090_v0 }
 0xf6a   :  { %1593 = vtanh.f32 %v1100_v7 }
 0xf75   :  { %v1592_v11 = vpop.eup %1591 }
 0xf76   :  { %1078 = vrot.lane.b32.xlu0 %v1592_v11, %s1628_s3 }
 0xf77   :  { %v1594_v15 = vpop.eup %1593 }
 0xf78   :  { %1103 = vrot.lane.b32.xlu1 %v1594_v15, %s1628_s3 }
 0xfe8   :  { %v1079_v22 = vpop.permute.xlu0 %1078 }
 0xfe9   :  { %v1081_v27 = vmul.f32 %v1588_v25, %v1079_v22 }
 0xfea   :  { %v1104_v28 = vpop.permute.xlu1 %1103 }
 0xfeb   :  { %1108 = vrot.lane.b32.xlu0 %v1081_v27, %s1629_s11  ;;  %v1106_v29 = vmul.f32 %v1590_v63, %v1104_v28 }
 0xfed   :  { %1113 = vrot.lane.b32.xlu1 %v1106_v29, %s1628_s3 }
 0xfef   :  { %1119 = vrot.lane.b32.xlu0 %v1075_v62, %s1630_s12 }
0x105d   :  { %v1109_v30 = vpop.permute.xlu0 %1108 }
0x105e   :  { %1482 = vst.msk [vmem:[%s2180_s4 + $0x28] sm:$0xff] %vm48_vm0, %v1109_v30 }
0x105f   :  { %v1114_v59 = vpop.permute.xlu1 %1113 }
0x1060   :  { %1483 = vst.msk [vmem:[%s2180_s4 + $0x10] sm:$0xff] %vm361_vm1, %v1114_v59  ;;  %v1117_v31 = vsel %vm48_vm0, %v1109_v30, %v1114_v59 }
0x1061   :  { %1484 = vmatmul.mubr.msk.f32.vlgmr.msra.gmra.mxu0 %vm218_vm2, %v1117_v31  ;;  %v1120_v34 = vpop.permute.xlu0 %1119 }
0x1062   :  { %v1122_v61 = vsel %vm48_vm0, %v1120_v34, %v1100_v7 }
0x1121   :  { %v1192_v32 = vpop.f32.mrf.mxu0 }
0x1122   :  { %v1199_v57 = vadd.f32 %v1192_v32, %v1889_v9 }
0x1123   :  { %v1194_v1 = vpop.f32.mrf.mxu0 }
0x1124   :  { %1595 = vtanh.f32 %v1199_v57  ;;  %v1228_v33 = vadd.f32 %v1194_v1, %v1871_v47  ;;  %v1485_v50 = vmul.f32 -1.442695, %v1199_v57 }
0x1126   :  { %1597 = vtanh.f32 %v1228_v33  ;;  %v1486_v35 = vmul.f32 -1.442695, %v1228_v33 }
0x1127   :  { %1599 = vpow2.f32 %v1485_v50 }
0x1128   :  { %1601 = vpow2.f32 %v1486_v35 }
0x1131   :  { %v1596_v55 = vpop.eup %1595 }
0x1132   :  { %1213 = vrot.lane.b32.xlu1 %v1596_v55, %s1628_s3 }
0x1133   :  { %v1598_v44 = vpop.eup %1597 }
0x1134   :  { %1238 = vrot.lane.b32.xlu0 %v1598_v44, %s1628_s3  ;;  %v1600_v9 = vpop.eup %1599 }
0x1135   :  { %v1602_v36 = vpop.eup %1601  ;;  %v1203_v2 = vadd.f32 1.0, %v1600_v9 }
0x1136   :  { %1208 = vrot.lane.b32.xlu1 %v1122_v61, %s1629_s11  ;;  %v1232_v47 = vadd.f32 1.0, %v1602_v36 }
0x1137   :  { %1603 = vrcp.f32 %v1203_v2 }
0x1138   :  { %1605 = vrcp.f32 %v1232_v47 }
0x1144   :  { %v1604_v13 = vpop.eup %1603 }
0x1145   :  { %v1606_v39 = vpop.eup %1605 }
0x1146   :  { %v1236_v49 = vmul.f32 %v1606_v39, %v1122_v61 }
0x11a4   :  { %v1214_v37 = vpop.permute.xlu1 %1213 }
0x11a5   :  { %v1216_v38 = vmul.f32 %v1604_v13, %v1214_v37 }
0x11a6   :  { %v1239_v40 = vpop.permute.xlu0 %1238 }
0x11a7   :  { %1218 = vrot.lane.b32.xlu0 %v1216_v38, %s1629_s11  ;;  %v1241_v41 = vmul.f32 %v1606_v39, %v1239_v40 }
0x11a8   :  { %v1209_v43 = vpop.permute.xlu1 %1208 }
0x11a9   :  { %1243 = vrot.lane.b32.xlu1 %v1241_v41, %s1629_s11  ;;  %v1211_v45 = vmul.f32 %v1604_v13, %v1209_v43 }
0x1219   :  { %v1219_v46 = vpop.permute.xlu0 %1218 }
0x121a   :  { %v1221_v48 = vadd.f32 %v1219_v46, %v1211_v45 }
0x121b   :  { %v1244_v51 = vpop.permute.xlu1 %1243 }
0x121c   :  { %1607 = vtanh.f32 %v1221_v48  ;;  %v1246_v3 = vadd.f32 %v1244_v51, %v1236_v49 }
0x121e   :  { %1609 = vtanh.f32 %v1246_v3 }
0x1229   :  { %v1608_v4 = vpop.eup %1607 }
0x122a   :  { %1224 = vrot.lane.b32.xlu0 %v1608_v4, %s1628_s3 }
0x122b   :  { %v1610_v6 = vpop.eup %1609 }
0x122c   :  { %1249 = vrot.lane.b32.xlu1 %v1610_v6, %s1628_s3 }
0x129c   :  { %v1225_v8 = vpop.permute.xlu0 %1224 }
0x129d   :  { %v1227_v10 = vmul.f32 %v1604_v13, %v1225_v8 }
0x129e   :  { %v1250_v12 = vpop.permute.xlu1 %1249 }
0x129f   :  { %1254 = vrot.lane.b32.xlu0 %v1227_v10, %s1629_s11  ;;  %v1252_v14 = vmul.f32 %v1606_v39, %v1250_v12 }
0x12a1   :  { %1259 = vrot.lane.b32.xlu1 %v1252_v14, %s1628_s3 }
0x12a3   :  { %1265 = vrot.lane.b32.xlu0 %v1221_v48, %s1630_s12 }
0x1311   :  { %v1255_v16 = vpop.permute.xlu0 %1254 }
0x1312   :  { %1487 = vst.msk [vmem:[%s2180_s4 + $0x30] sm:$0xff] %vm48_vm0, %v1255_v16 }
0x1313   :  { %v1260_v18 = vpop.permute.xlu1 %1259 }
0x1314   :  { %1488 = vst.msk [vmem:[%s2180_s4 + $0x8] sm:$0xff] %vm361_vm1, %v1260_v18  ;;  %v1263_v19 = vsel %vm48_vm0, %v1255_v16, %v1260_v18 }
0x1315   :  { %1489 = vmatmul.mubr.msk.f32.vlgmr.msra.gmra.mxu1 %vm218_vm2, %v1263_v19  ;;  %v1266_v26 = vpop.permute.xlu0 %1265 }
0x1316   :  { %v1268_v63 = vsel %vm48_vm0, %v1266_v26, %v1246_v3 }
0x13d5   :  { %v1338_v20 = vpop.f32.mrf.mxu1 }
0x13d6   :  { %v1345_v21 = vadd.f32 %v1338_v20, %v1894_v17 }
0x13d7   :  { %v1340_v23 = vpop.f32.mrf.mxu1 }
0x13d8   :  { %1611 = vtanh.f32 %v1345_v21  ;;  %v1374_v24 = vadd.f32 %v1340_v23, %v1867_v42  ;;  %v1490_v52 = vmul.f32 -1.442695, %v1345_v21 }
0x13da   :  { %1613 = vtanh.f32 %v1374_v24  ;;  %v1491_v54 = vmul.f32 -1.442695, %v1374_v24 }
0x13db   :  { %1615 = vpow2.f32 %v1490_v52 }
0x13dc   :  { %1617 = vpow2.f32 %v1491_v54 }
0x13e5   :  { %v1612_v25 = vpop.eup %1611 }
0x13e6   :  { %1359 = vrot.lane.b32.xlu1 %v1612_v25, %s1628_s3 }
0x13e7   :  { %v1614_v53 = vpop.eup %1613 }
0x13e8   :  { %1384 = vrot.lane.b32.xlu0 %v1614_v53, %s1628_s3  ;;  %v1616_v17 = vpop.eup %1615 }
0x13e9   :  { %v1618_v56 = vpop.eup %1617  ;;  %v1349_v58 = vadd.f32 1.0, %v1616_v17 }
0x13ea   :  { %1354 = vrot.lane.b32.xlu1 %v1268_v63, %s1629_s11  ;;  %v1378_v42 = vadd.f32 1.0, %v1618_v56 }
0x13eb   :  { %1619 = vrcp.f32 %v1349_v58 }
0x13ec   :  { %1621 = vrcp.f32 %v1378_v42 }
0x13f8   :  { %v1620_v60 = vpop.eup %1619 }
0x13f9   :  { %v1622_v5 = vpop.eup %1621 }
0x13fa   :  { %v1382_v29 = vmul.f32 %v1622_v5, %v1268_v63 }
0x1458   :  { %v1360_v62 = vpop.permute.xlu1 %1359 }
0x1459   :  { %v1362_v0 = vmul.f32 %v1620_v60, %v1360_v62 }
0x145a   :  { %v1385_v7 = vpop.permute.xlu0 %1384 }
0x145b   :  { %1364 = vrot.lane.b32.xlu0 %v1362_v0, %s1629_s11  ;;  %v1387_v11 = vmul.f32 %v1622_v5, %v1385_v7 }
0x145c   :  { %v1355_v15 = vpop.permute.xlu1 %1354 }
0x145d   :  { %1389 = vrot.lane.b32.xlu1 %v1387_v11, %s1629_s11  ;;  %v1357_v22 = vmul.f32 %v1620_v60, %v1355_v15 }
0x14cd   :  { %v1365_v27 = vpop.permute.xlu0 %1364 }
0x14ce   :  { %v1367_v28 = vadd.f32 %v1365_v27, %v1357_v22 }
0x14cf   :  { %v1390_v30 = vpop.permute.xlu1 %1389 }
0x14d0   :  { %1623 = vtanh.f32 %v1367_v28  ;;  %v1392_v59 = vadd.f32 %v1390_v30, %v1382_v29 }
0x14d2   :  { %1625 = vtanh.f32 %v1392_v59 }
0x14dd   :  { %v1624_v31 = vpop.eup %1623 }
0x14de   :  { %1370 = vrot.lane.b32.xlu0 %v1624_v31, %s1628_s3 }
0x14df   :  { %v1626_v32 = vpop.eup %1625 }
0x14e0   :  { %1395 = vrot.lane.b32.xlu1 %v1626_v32, %s1628_s3 }
0x1550   :  { %v1371_v57 = vpop.permute.xlu0 %1370 }
0x1551   :  { %v1373_v1 = vmul.f32 %v1620_v60, %v1371_v57 }
0x1552   :  { %v1396_v33 = vpop.permute.xlu1 %1395 }
0x1553   :  { %1400 = vrot.lane.b32.xlu0 %v1373_v1, %s1629_s11  ;;  %v1398_v55 = vmul.f32 %v1622_v5, %v1396_v33 }
0x1555   :  { %1405 = vrot.lane.b32.xlu1 %v1398_v55, %s1628_s3 }
0x1557   :  { %1411 = vrot.lane.b32.xlu0 %v1367_v28, %s1630_s12 }
0x15c5   :  { %v1401_v34 = vpop.permute.xlu0 %1400 }
0x15c6   :  { %1492 = vst.msk [vmem:[%s2180_s4 + $0x38] sm:$0xff] %vm48_vm0, %v1401_v34 }
0x15c7   :  { %v1406_v44 = vpop.permute.xlu1 %1405 }
0x15c8   :  { %1408 = vst.msk [vmem:[%s2180_s4] sm:$0xff] %vm361_vm1, %v1406_v44  ;;  %v1409_v61 = vsel %vm48_vm0, %v1401_v34, %v1406_v44 }
0x15c9   :  { %v1412_v50 = vpop.permute.xlu0 %1411  ;;  %1417 = vrot.lane.b32.xlu1 %v1409_v61, %s1630_s12  ;;  %1415 = vst.msk [vmem:[%s2181_s5] sm:$0xff] %vm48_vm0, %v1409_v61 }
0x15ca   :  { %v1414_v35 = vsel %vm48_vm0, %v1412_v50, %v1392_v59 }
0x15cb   :  { %1424 = vrot.lane.b32.xlu0 %v1414_v35, %s1630_s12  ;;  %1422 = vst.msk [vmem:[%s2182_s6] sm:$0xff] %vm48_vm0, %v1414_v35 }
0x163b   :  { %v1418_v9 = vpop.permute.xlu1 %1417 }
0x163c   :  { %1493 = vst.msk [vmem:[%s2181_s5 + $0x8] sm:$0xff] %vm48_vm0, %v1418_v9 }
0x163d   :  { %v1425_v36 = vpop.permute.xlu0 %1424 }
0x163e   :  { %1494 = vst.msk [vmem:[%s2182_s6 + $0x8] sm:$0xff] %vm48_vm0, %v1425_v36 }

</bundles_post_ra>
